<compile_context>
chip_gen: v5e
topology: v5e:2x2
jax: 0.10.0
libtpu: 0.0.40
codegen_flags: <defaults>
</compile_context>

<pallas_src>
import jax
import jax.numpy as jnp
from jax.experimental import pallas as pl
from jax.experimental.pallas import tpu as pltpu

BN_EPS = 1e-5


def _round_up(x, m):
    return ((x + m - 1) // m) * m


# ------------------------------- fused kernel ------------------------------ #

def _make_kernel(Nb, R1, R2, R3, n1, n2, n3):
    """Nb = W // 128 lane-blocks per input row; R1/R2/R3 = slab row counts of
    the conv1/conv2/conv3 outputs (rows are flattened h*Nb + w positions);
    n1/n2/n3 = number of valid spatial positions per layer."""
    inv1, inv2, inv3 = 1.0 / n1, 1.0 / n2, 1.0 / n3

    def _relu_bn(acc, b, g, be, m, inv_n):
        # ReLU -> train-mode BatchNorm (per-image batch stats, biased var),
        # two-pass variance, masked so invalid rows contribute nothing and
        # come out exactly 0.
        y = jnp.maximum(acc + b, 0.0) * m
        mean = jnp.sum(y, axis=0, keepdims=True) * inv_n
        d = (y - mean) * m
        var = jnp.sum(d * d, axis=0, keepdims=True) * inv_n
        scale = g * jax.lax.rsqrt(var + BN_EPS)
        return (d * scale + be) * m

    def kernel(x_ref, mk_ref, sc_ref, w1_ref, wl_ref, o_ref,
               g_ref, a1_ref, a2_ref):
        # ---- conv1: 1->8, k=(3,256), s=(1,128) --------------------------- #
        # Gather the 6 shifted taps into (R1, 768) bf16 and do ONE K=768 MXU
        # matmul.  Output lane l<64 holds conv1 channel l//8 (8x replication
        # so conv2/conv3 become lane-aligned depthwise FMAs).
        for dh in range(3):
            for j in range(2):
                t = 2 * dh + j
                s = dh * Nb + j
                g_ref[:, 128 * t:128 * (t + 1)] = (
                    x_ref[pl.ds(s, R1), :].astype(jnp.bfloat16))
        acc = jnp.dot(g_ref[...], w1_ref[...],
                      preferred_element_type=jnp.float32)
        a1_ref[...] = _relu_bn(acc, sc_ref[18:19, :], sc_ref[19:20, :],
                               sc_ref[20:21, :], mk_ref[0], inv1)

        # ---- conv2: 8->32, 3x3, groups=8 (VPU depthwise) ------------------ #
        acc = a1_ref[pl.ds(0, R2), :] * sc_ref[0:1, :]
        for t in range(1, 9):
            dh, dw = divmod(t, 3)
            acc = acc + a1_ref[pl.ds(dh * Nb + dw, R2), :] * sc_ref[t:t + 1, :]
        a2_ref[...] = _relu_bn(acc, sc_ref[21:22, :], sc_ref[22:23, :],
                               sc_ref[23:24, :], mk_ref[1][:R2], inv2)

        # ---- conv3: 32->64, 3x3, groups=32 (VPU depthwise) ---------------- #
        acc = a2_ref[pl.ds(0, R3), :] * sc_ref[9:10, :]
        for t in range(1, 9):
            dh, dw = divmod(t, 3)
            acc = acc + (a2_ref[pl.ds(dh * Nb + dw, R3), :]
                         * sc_ref[9 + t:10 + t, :])
        a3 = _relu_bn(acc, sc_ref[24:25, :], sc_ref[25:26, :],
                      sc_ref[26:27, :], mk_ref[2][:R3], inv3)

        # ---- AdaptiveAvgPool2d(1) + Linear(64->62), lane-padded ----------- #
        pooled = jnp.sum(a3, axis=0, keepdims=True) * inv3          # (1, 128)
        logits = (jnp.dot(pooled, wl_ref[...],
                          preferred_element_type=jnp.float32)
                  + sc_ref[27:28, :])
        o_ref[...] = jnp.broadcast_to(logits, (8, 128))

    return kernel


# --------------------------- parameter preparation ------------------------- #

def init_params(key):
    """PyTorch-layout parameters (deterministic, random values)."""
    ks = jax.random.split(key, 8)
    p = {
        "w1": jax.random.normal(ks[0], (8, 1, 3, 256), jnp.float32) * 0.05,
        "b1": jax.random.normal(ks[1], (8,), jnp.float32) * 0.05,
        "w2": jax.random.normal(ks[2], (32, 1, 3, 3), jnp.float32) * 0.1,
        "b2": jax.random.normal(ks[3], (32,), jnp.float32) * 0.05,
        "w3": jax.random.normal(ks[4], (64, 1, 3, 3), jnp.float32) * 0.1,
        "b3": jax.random.normal(ks[5], (64,), jnp.float32) * 0.05,
        "wl": jax.random.normal(ks[6], (62, 64), jnp.float32) * 0.1,
        "bl": jax.random.normal(ks[7], (62,), jnp.float32) * 0.05,
    }
    for name, c in (("bn1", 8), ("bn2", 32), ("bn3", 64)):
        p[name + "_g"] = jnp.ones((c,), jnp.float32)   # PyTorch BN default
        p[name + "_b"] = jnp.zeros((c,), jnp.float32)
    return p


def prepare_params(p):
    """One-time repack, outside the jitted per-forward path:
       * conv1  -> single (768,128) bf16 tap matrix, output channels written
         8x lane-replicated (lane l<64 = channel l//8).
       * conv2/conv3 -> 9 depthwise (1,128) tap rows each, lane-aligned with
         the replicated layout (conv2 out-ch l//2 at lane l, conv3 out-ch l).
       * every (1,128) row (taps, biases, BN gamma/beta, linear bias) packed
         into ONE (32,128) f32 array.  Unused lanes get gamma=0/bias=0 so
         they stay exactly 0 through BN."""
    f32 = jnp.float32

    def lane_rep(v, rep, fill=0.0):
        v = jnp.repeat(jnp.asarray(v, f32), rep)
        row = jnp.full((128,), fill, f32)
        return row.at[:v.shape[0]].set(v)

    # conv1 (8,1,3,256): rows = ((dh, j), k) with tap t = 2*dh + j.
    w1 = jnp.asarray(p["w1"], f32)[:, 0].reshape(8, 3, 2, 128)    # (c,dh,j,k)
    w1m = jnp.transpose(w1, (1, 2, 3, 0)).reshape(768, 8)         # (tap*k, c)
    w1m = jnp.repeat(w1m, 8, axis=1)                              # lane l = ch l//8
    w1m = jnp.pad(w1m, ((0, 0), (0, 64))).astype(jnp.bfloat16)    # (768,128)

    w2 = jnp.asarray(p["w2"], f32)[:, 0].reshape(32, 9)   # (out ch, 3*dh+dw)
    w3 = jnp.asarray(p["w3"], f32)[:, 0].reshape(64, 9)

    rows = [lane_rep(w2[:, t], 2) for t in range(9)]       # rows 0..8
    rows += [lane_rep(w3[:, t], 1) for t in range(9)]      # rows 9..17
    rows += [lane_rep(p["b1"], 8), lane_rep(p["bn1_g"], 8), lane_rep(p["bn1_b"], 8),
             lane_rep(p["b2"], 2), lane_rep(p["bn2_g"], 2), lane_rep(p["bn2_b"], 2),
             lane_rep(p["b3"], 1), lane_rep(p["bn3_g"], 1), lane_rep(p["bn3_b"], 1),
             lane_rep(p["bl"], 1)]                          # rows 18..27
    rows += [jnp.zeros((128,), f32)] * (32 - len(rows))
    scal = jnp.stack(rows, axis=0)                          # (32, 128)

    wlt = jnp.pad(jnp.asarray(p["wl"], f32).T, ((0, 64), (0, 66)))   # (128,128)

    return {"w1m": w1m, "scal": scal, "wlt": wlt}


# ---------------------------------- forward --------------------------------- #

def _valid_mask(R, Nb, Hl, Wl):
    """(R,128) f32 mask: 1 where flattened row q = h*Nb + w is a valid
    (h < Hl, w < Wl) spatial position."""
    q = jnp.arange(R, dtype=jnp.int32)
    ok = ((q // Nb) < Hl) & ((q % Nb) < Wl)
    return jnp.broadcast_to(ok.astype(jnp.float32)[:, None], (R, 128))


@jax.jit
def convnet_forward(x_nchw, prepped):
    """Batched forward; each image uses its own (training-mode) BN stats,
    i.e. exactly the original module run once per image."""
    N, Cin, H, W = x_nchw.shape
    assert Cin == 1, "ConvNet expects a single input channel"
    # conv1 k=(3,256)/s=(1,128) plus two valid 3x3 convs need Nb=W/128 >= 6
    # (else conv3's output is empty -> divide by zero) and H >= 5.
    assert W % 128 == 0 and W >= 768 and H >= 5, "need W%128==0, W>=768, H>=5"

    Nb = W // 128
    Hp = H + 2                        # replicate-padded height
    H1, W1 = H, Nb - 1                # conv1 output grid
    H2, W2 = H1 - 2, W1 - 2           # conv2 (3x3 valid)
    H3, W3 = H2 - 2, W2 - 2           # conv3 (3x3 valid)

    # Slab row counts (flattened q = h*Nb + w), multiples of 16 (bf16 tiles),
    # sized so every shifted-tap read stays inside the layer above.
    R3 = _round_up((H3 - 1) * Nb + W3, 16)
    R2 = _round_up(max((H2 - 1) * Nb + W2, R3 + 2 * Nb + 2), 16)
    R1 = _round_up(max((H1 - 1) * Nb + W1, R2 + 2 * Nb + 2), 16)
    XR = _round_up(max(Hp * Nb, R1 + 2 * Nb + 1), 16)

    # Replicate-pad H, block W into 128-lane rows, zero-pad trailing rows.
    # TODO(synk): fold this padding into the kernel for very large H*W.
    xp = jnp.pad(x_nchw[:, 0], ((0, 0), (1, 1), (0, 0)), mode="edge")
    xflat = xp.reshape(N, Hp * Nb, 128)
    xflat = jnp.pad(xflat, ((0, 0), (0, XR - Hp * Nb), (0, 0)))

    masks = jnp.stack([
        _valid_mask(R1, Nb, H1, W1),
        jnp.pad(_valid_mask(R2, Nb, H2, W2), ((0, R1 - R2), (0, 0))),
        jnp.pad(_valid_mask(R3, Nb, H3, W3), ((0, R1 - R3), (0, 0))),
    ])                                                         # (3, R1, 128)

    kernel = _make_kernel(Nb, R1, R2, R3,
                          float(H1 * W1), float(H2 * W2), float(H3 * W3))

    const3 = lambda b: (0, 0, 0)
    const2 = lambda b: (0, 0)
    grid_spec = pltpu.PrefetchScalarGridSpec(
        num_scalar_prefetch=0,
        grid=(N,),                                    # one image per grid step
        in_specs=[
            pl.BlockSpec((None, XR, 128), lambda b: (b, 0, 0)),  # per-image slab
            pl.BlockSpec((3, R1, 128), const3),                  # masks (resident)
            pl.BlockSpec((32, 128), const2),                     # packed scalars
            pl.BlockSpec((768, 128), const2),                    # conv1 taps (bf16)
            pl.BlockSpec((128, 128), const2),                    # linear weight
        ],
        out_specs=pl.BlockSpec((None, 8, 128), lambda b: (b, 0, 0)),
        scratch_shapes=[
            pltpu.VMEM((R1, 768), jnp.bfloat16),    # conv1 gathered-tap LHS
            pltpu.VMEM((R1, 128), jnp.float32),     # a1 slab
            pltpu.VMEM((R2, 128), jnp.float32),     # a2 slab
        ],
    )

    out = pl.pallas_call(
        kernel,
        out_shape=jax.ShapeDtypeStruct((N, 8, 128), jnp.float32),
        grid_spec=grid_spec,
        compiler_params=pltpu.CompilerParams(
            dimension_semantics=("parallel",)),        # both TCs on v7x
    )(xflat, masks, prepped["scal"], prepped["w1m"], prepped["wlt"])

    return out[:, 0, :62]


if __name__ == "__main__":
    key = jax.random.PRNGKey(0)
    k_x, k_p = jax.random.split(key)
    # Smallest legal spatial size: W >= 768 (multiple of 128) and H >= 5.
    # Batch of 4 images processed independently on a "parallel" grid so the
    # weights are DMA'd once and stay VMEM-resident for all images.
    x = jax.random.normal(k_x, (4, 1, 8, 768), jnp.float32)
    params = init_params(k_p)
    prepped = prepare_params(params)            # one-time weight repack
    y = jax.block_until_ready(convnet_forward(x, prepped))
    assert y.shape == (4, 62) and y.dtype == jnp.float32
    assert bool(jnp.all(jnp.isfinite(y)))
    print("KERNEL_OK")
</pallas_src>

<mosaic_0001>
module attributes {stable_mosaic.version = 11 : i64} {
  func.func @kernel(%arg0: i32, %arg1: memref<1x80x128xf32, #tpu.memory_space<vmem>>, %arg2: memref<3x64x128xf32, #tpu.memory_space<vmem>>, %arg3: memref<32x128xf32, #tpu.memory_space<vmem>>, %arg4: memref<768x128xbf16, #tpu.memory_space<vmem>>, %arg5: memref<128x128xf32, #tpu.memory_space<vmem>>, %arg6: memref<1x8x128xf32, #tpu.memory_space<vmem>>, %arg7: memref<64x768xbf16, #tpu.memory_space<vmem>>, %arg8: memref<64x128xf32, #tpu.memory_space<vmem>>, %arg9: memref<48x128xf32, #tpu.memory_space<vmem>>) attributes {dimension_semantics = [#tpu.dimension_semantics<parallel>], iteration_bounds = array<i64: 4>, scalar_prefetch = 0 : i64, scratch_operands = 3 : i64, tpu.core_type = #tpu.core_type<tc>, window_params = [{transform_indices = @transform_0, window_bounds = array<i64: 1, 80, 128>}, {pipeline_mode = #tpu.pipeline_mode<synchronous>, transform_indices = @transform_1, window_bounds = array<i64: 3, 64, 128>}, {pipeline_mode = #tpu.pipeline_mode<synchronous>, transform_indices = @transform_2, window_bounds = array<i64: 32, 128>}, {pipeline_mode = #tpu.pipeline_mode<synchronous>, transform_indices = @transform_3, window_bounds = array<i64: 768, 128>}, {pipeline_mode = #tpu.pipeline_mode<synchronous>, transform_indices = @transform_4, window_bounds = array<i64: 128, 128>}, {transform_indices = @transform_5, window_bounds = array<i64: 1, 8, 128>}]} {
    %c0 = arith.constant 0 : index
    %c0_0 = arith.constant 0 : index
    %c0_1 = arith.constant 0 : index
    %0 = vector.load %arg1[%c0, %c0_0, %c0_1] : memref<1x80x128xf32, #tpu.memory_space<vmem>>, vector<1x64x128xf32>
    %1 = vector.shape_cast %0 : vector<1x64x128xf32> to vector<64x128xf32>
    %2 = arith.truncf %1 : vector<64x128xf32> to vector<64x128xbf16>
    %c0_2 = arith.constant 0 : index
    %c0_3 = arith.constant 0 : index
    %3 = vector.load %arg7[%c0_2, %c0_3] : memref<64x768xbf16, #tpu.memory_space<vmem>>, vector<64x128xbf16>
    tpu.vector_store %arg7[%c0_2, %c0_3], %2 {strides = array<i32>} : memref<64x768xbf16, #tpu.memory_space<vmem>>, vector<64x128xbf16>,
    %c0_4 = arith.constant 0 : index
    %c1 = arith.constant 1 : index
    %c0_5 = arith.constant 0 : index
    %4 = vector.load %arg1[%c0_4, %c1, %c0_5] : memref<1x80x128xf32, #tpu.memory_space<vmem>>, vector<1x64x128xf32>
    %5 = vector.shape_cast %4 : vector<1x64x128xf32> to vector<64x128xf32>
    %6 = arith.truncf %5 : vector<64x128xf32> to vector<64x128xbf16>
    %c0_6 = arith.constant 0 : index
    %c128 = arith.constant 128 : index
    %7 = vector.load %arg7[%c0_6, %c128] : memref<64x768xbf16, #tpu.memory_space<vmem>>, vector<64x128xbf16>
    tpu.vector_store %arg7[%c0_6, %c128], %6 {strides = array<i32>} : memref<64x768xbf16, #tpu.memory_space<vmem>>, vector<64x128xbf16>,
    %c0_7 = arith.constant 0 : index
    %c6 = arith.constant 6 : index
    %c0_8 = arith.constant 0 : index
    %8 = vector.load %arg1[%c0_7, %c6, %c0_8] : memref<1x80x128xf32, #tpu.memory_space<vmem>>, vector<1x64x128xf32>
    %9 = vector.shape_cast %8 : vector<1x64x128xf32> to vector<64x128xf32>
    %10 = arith.truncf %9 : vector<64x128xf32> to vector<64x128xbf16>
    %c0_9 = arith.constant 0 : index
    %c256 = arith.constant 256 : index
    %11 = vector.load %arg7[%c0_9, %c256] : memref<64x768xbf16, #tpu.memory_space<vmem>>, vector<64x128xbf16>
    tpu.vector_store %arg7[%c0_9, %c256], %10 {strides = array<i32>} : memref<64x768xbf16, #tpu.memory_space<vmem>>, vector<64x128xbf16>,
    %c0_10 = arith.constant 0 : index
    %c7 = arith.constant 7 : index
    %c0_11 = arith.constant 0 : index
    %12 = vector.load %arg1[%c0_10, %c7, %c0_11] : memref<1x80x128xf32, #tpu.memory_space<vmem>>, vector<1x64x128xf32>
    %13 = vector.shape_cast %12 : vector<1x64x128xf32> to vector<64x128xf32>
    %14 = arith.truncf %13 : vector<64x128xf32> to vector<64x128xbf16>
    %c0_12 = arith.constant 0 : index
    %c384 = arith.constant 384 : index
    %15 = vector.load %arg7[%c0_12, %c384] : memref<64x768xbf16, #tpu.memory_space<vmem>>, vector<64x128xbf16>
    tpu.vector_store %arg7[%c0_12, %c384], %14 {strides = array<i32>} : memref<64x768xbf16, #tpu.memory_space<vmem>>, vector<64x128xbf16>,
    %c0_13 = arith.constant 0 : index
    %c12 = arith.constant 12 : index
    %c0_14 = arith.constant 0 : index
    %16 = vector.load %arg1[%c0_13, %c12, %c0_14] : memref<1x80x128xf32, #tpu.memory_space<vmem>>, vector<1x64x128xf32>
    %17 = vector.shape_cast %16 : vector<1x64x128xf32> to vector<64x128xf32>
    %18 = arith.truncf %17 : vector<64x128xf32> to vector<64x128xbf16>
    %c0_15 = arith.constant 0 : index
    %c512 = arith.constant 512 : index
    %19 = vector.load %arg7[%c0_15, %c512] : memref<64x768xbf16, #tpu.memory_space<vmem>>, vector<64x128xbf16>
    tpu.vector_store %arg7[%c0_15, %c512], %18 {strides = array<i32>} : memref<64x768xbf16, #tpu.memory_space<vmem>>, vector<64x128xbf16>,
    %c0_16 = arith.constant 0 : index
    %c13 = arith.constant 13 : index
    %c0_17 = arith.constant 0 : index
    %20 = vector.load %arg1[%c0_16, %c13, %c0_17] : memref<1x80x128xf32, #tpu.memory_space<vmem>>, vector<1x64x128xf32>
    %21 = vector.shape_cast %20 : vector<1x64x128xf32> to vector<64x128xf32>
    %22 = arith.truncf %21 : vector<64x128xf32> to vector<64x128xbf16>
    %c0_18 = arith.constant 0 : index
    %c640 = arith.constant 640 : index
    %23 = vector.load %arg7[%c0_18, %c640] : memref<64x768xbf16, #tpu.memory_space<vmem>>, vector<64x128xbf16>
    tpu.vector_store %arg7[%c0_18, %c640], %22 {strides = array<i32>} : memref<64x768xbf16, #tpu.memory_space<vmem>>, vector<64x128xbf16>,
    %c0_19 = arith.constant 0 : index
    %c0_20 = arith.constant 0 : index
    %24 = vector.load %arg7[%c0_19, %c0_20] : memref<64x768xbf16, #tpu.memory_space<vmem>>, vector<64x768xbf16>
    %c0_21 = arith.constant 0 : index
    %c0_22 = arith.constant 0 : index
    %25 = vector.load %arg4[%c0_21, %c0_22] : memref<768x128xbf16, #tpu.memory_space<vmem>>, vector<768x128xbf16>
    %cst = arith.constant dense<0.000000e+00> : vector<64x128xf32>
    %26 = tpu.matmul %24, %25, %cst {dimension_numbers = #tpu.dot_dimension_numbers<[1], [0], [0], [1], [0, 0, 1, 1], [], []>} : vector<64x768xbf16>, vector<768x128xbf16>, vector<64x128xf32> -> vector<64x128xf32>
    %c18 = arith.constant 18 : index
    %c0_23 = arith.constant 0 : index
    %27 = vector.load %arg3[%c18, %c0_23] : memref<32x128xf32, #tpu.memory_space<vmem>>, vector<1x128xf32>
    %c19 = arith.constant 19 : index
    %c0_24 = arith.constant 0 : index
    %28 = vector.load %arg3[%c19, %c0_24] : memref<32x128xf32, #tpu.memory_space<vmem>>, vector<1x128xf32>
    %c20 = arith.constant 20 : index
    %c0_25 = arith.constant 0 : index
    %29 = vector.load %arg3[%c20, %c0_25] : memref<32x128xf32, #tpu.memory_space<vmem>>, vector<1x128xf32>
    %c0_26 = arith.constant 0 : index
    %c0_27 = arith.constant 0 : index
    %c0_28 = arith.constant 0 : index
    %30 = vector.load %arg2[%c0_26, %c0_27, %c0_28] : memref<3x64x128xf32, #tpu.memory_space<vmem>>, vector<1x64x128xf32>
    %31 = vector.shape_cast %30 : vector<1x64x128xf32> to vector<64x128xf32>
    %32 = vector.broadcast %27 : vector<1x128xf32> to vector<64x128xf32>
    %33 = arith.addf %26, %32 : vector<64x128xf32>
    %cst_29 = arith.constant 0.000000e+00 : f32
    %34 = vector.broadcast %cst_29 : f32 to vector<64x128xf32>
    %35 = arith.maximumf %33, %34 : vector<64x128xf32>
    %36 = arith.mulf %35, %31 : vector<64x128xf32>
    %cst_30 = arith.constant dense<0.000000e+00> : vector<128xf32>
    %37 = vector.multi_reduction <add>, %36, %cst_30 [0] : vector<64x128xf32> to vector<128xf32>
    %38 = vector.shape_cast %37 : vector<128xf32> to vector<1x128xf32>
    %cst_31 = arith.constant 2.500000e-02 : f32
    %39 = vector.broadcast %cst_31 : f32 to vector<1x128xf32>
    %40 = arith.mulf %38, %39 : vector<1x128xf32>
    %41 = vector.broadcast %40 : vector<1x128xf32> to vector<64x128xf32>
    %42 = arith.subf %36, %41 : vector<64x128xf32>
    %43 = arith.mulf %42, %31 : vector<64x128xf32>
    %44 = arith.mulf %43, %43 : vector<64x128xf32>
    %cst_32 = arith.constant dense<0.000000e+00> : vector<128xf32>
    %45 = vector.multi_reduction <add>, %44, %cst_32 [0] : vector<64x128xf32> to vector<128xf32>
    %46 = vector.shape_cast %45 : vector<128xf32> to vector<1x128xf32>
    %cst_33 = arith.constant 2.500000e-02 : f32
    %47 = vector.broadcast %cst_33 : f32 to vector<1x128xf32>
    %48 = arith.mulf %46, %47 : vector<1x128xf32>
    %cst_34 = arith.constant 9.99999974E-6 : f32
    %49 = vector.broadcast %cst_34 : f32 to vector<1x128xf32>
    %50 = arith.addf %48, %49 : vector<1x128xf32>
    %51 = math.rsqrt %50 : vector<1x128xf32>
    %52 = arith.mulf %28, %51 : vector<1x128xf32>
    %53 = vector.broadcast %52 : vector<1x128xf32> to vector<64x128xf32>
    %54 = arith.mulf %43, %53 : vector<64x128xf32>
    %55 = vector.broadcast %29 : vector<1x128xf32> to vector<64x128xf32>
    %56 = arith.addf %54, %55 : vector<64x128xf32>
    %57 = arith.mulf %56, %31 : vector<64x128xf32>
    %c0_35 = arith.constant 0 : index
    %c0_36 = arith.constant 0 : index
    %58 = vector.load %arg8[%c0_35, %c0_36] : memref<64x128xf32, #tpu.memory_space<vmem>>, vector<64x128xf32>
    tpu.vector_store %arg8[%c0_35, %c0_36], %57 {strides = array<i32>} : memref<64x128xf32, #tpu.memory_space<vmem>>, vector<64x128xf32>,
    %c0_37 = arith.constant 0 : index
    %c0_38 = arith.constant 0 : index
    %59 = vector.load %arg8[%c0_37, %c0_38] : memref<64x128xf32, #tpu.memory_space<vmem>>, vector<48x128xf32>
    %c0_39 = arith.constant 0 : index
    %c0_40 = arith.constant 0 : index
    %60 = vector.load %arg3[%c0_39, %c0_40] : memref<32x128xf32, #tpu.memory_space<vmem>>, vector<1x128xf32>
    %61 = vector.broadcast %60 : vector<1x128xf32> to vector<48x128xf32>
    %62 = arith.mulf %59, %61 : vector<48x128xf32>
    %c1_41 = arith.constant 1 : index
    %c0_42 = arith.constant 0 : index
    %63 = vector.load %arg8[%c1_41, %c0_42] : memref<64x128xf32, #tpu.memory_space<vmem>>, vector<48x128xf32>
    %c1_43 = arith.constant 1 : index
    %c0_44 = arith.constant 0 : index
    %64 = vector.load %arg3[%c1_43, %c0_44] : memref<32x128xf32, #tpu.memory_space<vmem>>, vector<1x128xf32>
    %65 = vector.broadcast %64 : vector<1x128xf32> to vector<48x128xf32>
    %66 = arith.mulf %63, %65 : vector<48x128xf32>
    %67 = arith.addf %62, %66 : vector<48x128xf32>
    %c2 = arith.constant 2 : index
    %c0_45 = arith.constant 0 : index
    %68 = vector.load %arg8[%c2, %c0_45] : memref<64x128xf32, #tpu.memory_space<vmem>>, vector<48x128xf32>
    %c2_46 = arith.constant 2 : index
    %c0_47 = arith.constant 0 : index
    %69 = vector.load %arg3[%c2_46, %c0_47] : memref<32x128xf32, #tpu.memory_space<vmem>>, vector<1x128xf32>
    %70 = vector.broadcast %69 : vector<1x128xf32> to vector<48x128xf32>
    %71 = arith.mulf %68, %70 : vector<48x128xf32>
    %72 = arith.addf %67, %71 : vector<48x128xf32>
    %c6_48 = arith.constant 6 : index
    %c0_49 = arith.constant 0 : index
    %73 = vector.load %arg8[%c6_48, %c0_49] : memref<64x128xf32, #tpu.memory_space<vmem>>, vector<48x128xf32>
    %c3 = arith.constant 3 : index
    %c0_50 = arith.constant 0 : index
    %74 = vector.load %arg3[%c3, %c0_50] : memref<32x128xf32, #tpu.memory_space<vmem>>, vector<1x128xf32>
    %75 = vector.broadcast %74 : vector<1x128xf32> to vector<48x128xf32>
    %76 = arith.mulf %73, %75 : vector<48x128xf32>
    %77 = arith.addf %72, %76 : vector<48x128xf32>
    %c7_51 = arith.constant 7 : index
    %c0_52 = arith.constant 0 : index
    %78 = vector.load %arg8[%c7_51, %c0_52] : memref<64x128xf32, #tpu.memory_space<vmem>>, vector<48x128xf32>
    %c4 = arith.constant 4 : index
    %c0_53 = arith.constant 0 : index
    %79 = vector.load %arg3[%c4, %c0_53] : memref<32x128xf32, #tpu.memory_space<vmem>>, vector<1x128xf32>
    %80 = vector.broadcast %79 : vector<1x128xf32> to vector<48x128xf32>
    %81 = arith.mulf %78, %80 : vector<48x128xf32>
    %82 = arith.addf %77, %81 : vector<48x128xf32>
    %c8 = arith.constant 8 : index
    %c0_54 = arith.constant 0 : index
    %83 = vector.load %arg8[%c8, %c0_54] : memref<64x128xf32, #tpu.memory_space<vmem>>, vector<48x128xf32>
    %c5 = arith.constant 5 : index
    %c0_55 = arith.constant 0 : index
    %84 = vector.load %arg3[%c5, %c0_55] : memref<32x128xf32, #tpu.memory_space<vmem>>, vector<1x128xf32>
    %85 = vector.broadcast %84 : vector<1x128xf32> to vector<48x128xf32>
    %86 = arith.mulf %83, %85 : vector<48x128xf32>
    %87 = arith.addf %82, %86 : vector<48x128xf32>
    %c12_56 = arith.constant 12 : index
    %c0_57 = arith.constant 0 : index
    %88 = vector.load %arg8[%c12_56, %c0_57] : memref<64x128xf32, #tpu.memory_space<vmem>>, vector<48x128xf32>
    %c6_58 = arith.constant 6 : index
    %c0_59 = arith.constant 0 : index
    %89 = vector.load %arg3[%c6_58, %c0_59] : memref<32x128xf32, #tpu.memory_space<vmem>>, vector<1x128xf32>
    %90 = vector.broadcast %89 : vector<1x128xf32> to vector<48x128xf32>
    %91 = arith.mulf %88, %90 : vector<48x128xf32>
    %92 = arith.addf %87, %91 : vector<48x128xf32>
    %c13_60 = arith.constant 13 : index
    %c0_61 = arith.constant 0 : index
    %93 = vector.load %arg8[%c13_60, %c0_61] : memref<64x128xf32, #tpu.memory_space<vmem>>, vector<48x128xf32>
    %c7_62 = arith.constant 7 : index
    %c0_63 = arith.constant 0 : index
    %94 = vector.load %arg3[%c7_62, %c0_63] : memref<32x128xf32, #tpu.memory_space<vmem>>, vector<1x128xf32>
    %95 = vector.broadcast %94 : vector<1x128xf32> to vector<48x128xf32>
    %96 = arith.mulf %93, %95 : vector<48x128xf32>
    %97 = arith.addf %92, %96 : vector<48x128xf32>
    %c14 = arith.constant 14 : index
    %c0_64 = arith.constant 0 : index
    %98 = vector.load %arg8[%c14, %c0_64] : memref<64x128xf32, #tpu.memory_space<vmem>>, vector<48x128xf32>
    %c8_65 = arith.constant 8 : index
    %c0_66 = arith.constant 0 : index
    %99 = vector.load %arg3[%c8_65, %c0_66] : memref<32x128xf32, #tpu.memory_space<vmem>>, vector<1x128xf32>
    %100 = vector.broadcast %99 : vector<1x128xf32> to vector<48x128xf32>
    %101 = arith.mulf %98, %100 : vector<48x128xf32>
    %102 = arith.addf %97, %101 : vector<48x128xf32>
    %c21 = arith.constant 21 : index
    %c0_67 = arith.constant 0 : index
    %103 = vector.load %arg3[%c21, %c0_67] : memref<32x128xf32, #tpu.memory_space<vmem>>, vector<1x128xf32>
    %c22 = arith.constant 22 : index
    %c0_68 = arith.constant 0 : index
    %104 = vector.load %arg3[%c22, %c0_68] : memref<32x128xf32, #tpu.memory_space<vmem>>, vector<1x128xf32>
    %c23 = arith.constant 23 : index
    %c0_69 = arith.constant 0 : index
    %105 = vector.load %arg3[%c23, %c0_69] : memref<32x128xf32, #tpu.memory_space<vmem>>, vector<1x128xf32>
    %c1_70 = arith.constant 1 : index
    %c0_71 = arith.constant 0 : index
    %c0_72 = arith.constant 0 : index
    %106 = vector.load %arg2[%c1_70, %c0_71, %c0_72] : memref<3x64x128xf32, #tpu.memory_space<vmem>>, vector<1x64x128xf32>
    %107 = vector.shape_cast %106 : vector<1x64x128xf32> to vector<64x128xf32>
    %108 = vector.extract_strided_slice %107 {offsets = [0, 0], sizes = [48, 128], strides = [1, 1]} : vector<64x128xf32> to vector<48x128xf32>
    %109 = vector.broadcast %103 : vector<1x128xf32> to vector<48x128xf32>
    %110 = arith.addf %102, %109 : vector<48x128xf32>
    %cst_73 = arith.constant 0.000000e+00 : f32
    %111 = vector.broadcast %cst_73 : f32 to vector<48x128xf32>
    %112 = arith.maximumf %110, %111 : vector<48x128xf32>
    %113 = arith.mulf %112, %108 : vector<48x128xf32>
    %cst_74 = arith.constant dense<0.000000e+00> : vector<128xf32>
    %114 = vector.multi_reduction <add>, %113, %cst_74 [0] : vector<48x128xf32> to vector<128xf32>
    %115 = vector.shape_cast %114 : vector<128xf32> to vector<1x128xf32>
    %cst_75 = arith.constant 0.055555556 : f32
    %116 = vector.broadcast %cst_75 : f32 to vector<1x128xf32>
    %117 = arith.mulf %115, %116 : vector<1x128xf32>
    %118 = vector.broadcast %117 : vector<1x128xf32> to vector<48x128xf32>
    %119 = arith.subf %113, %118 : vector<48x128xf32>
    %120 = arith.mulf %119, %108 : vector<48x128xf32>
    %121 = arith.mulf %120, %120 : vector<48x128xf32>
    %cst_76 = arith.constant dense<0.000000e+00> : vector<128xf32>
    %122 = vector.multi_reduction <add>, %121, %cst_76 [0] : vector<48x128xf32> to vector<128xf32>
    %123 = vector.shape_cast %122 : vector<128xf32> to vector<1x128xf32>
    %cst_77 = arith.constant 0.055555556 : f32
    %124 = vector.broadcast %cst_77 : f32 to vector<1x128xf32>
    %125 = arith.mulf %123, %124 : vector<1x128xf32>
    %cst_78 = arith.constant 9.99999974E-6 : f32
    %126 = vector.broadcast %cst_78 : f32 to vector<1x128xf32>
    %127 = arith.addf %125, %126 : vector<1x128xf32>
    %128 = math.rsqrt %127 : vector<1x128xf32>
    %129 = arith.mulf %104, %128 : vector<1x128xf32>
    %130 = vector.broadcast %129 : vector<1x128xf32> to vector<48x128xf32>
    %131 = arith.mulf %120, %130 : vector<48x128xf32>
    %132 = vector.broadcast %105 : vector<1x128xf32> to vector<48x128xf32>
    %133 = arith.addf %131, %132 : vector<48x128xf32>
    %134 = arith.mulf %133, %108 : vector<48x128xf32>
    %c0_79 = arith.constant 0 : index
    %c0_80 = arith.constant 0 : index
    %135 = vector.load %arg9[%c0_79, %c0_80] : memref<48x128xf32, #tpu.memory_space<vmem>>, vector<48x128xf32>
    tpu.vector_store %arg9[%c0_79, %c0_80], %134 {strides = array<i32>} : memref<48x128xf32, #tpu.memory_space<vmem>>, vector<48x128xf32>,
    %c0_81 = arith.constant 0 : index
    %c0_82 = arith.constant 0 : index
    %136 = vector.load %arg9[%c0_81, %c0_82] : memref<48x128xf32, #tpu.memory_space<vmem>>, vector<32x128xf32>
    %c9 = arith.constant 9 : index
    %c0_83 = arith.constant 0 : index
    %137 = vector.load %arg3[%c9, %c0_83] : memref<32x128xf32, #tpu.memory_space<vmem>>, vector<1x128xf32>
    %138 = vector.broadcast %137 : vector<1x128xf32> to vector<32x128xf32>
    %139 = arith.mulf %136, %138 : vector<32x128xf32>
    %c1_84 = arith.constant 1 : index
    %c0_85 = arith.constant 0 : index
    %140 = vector.load %arg9[%c1_84, %c0_85] : memref<48x128xf32, #tpu.memory_space<vmem>>, vector<32x128xf32>
    %c10 = arith.constant 10 : index
    %c0_86 = arith.constant 0 : index
    %141 = vector.load %arg3[%c10, %c0_86] : memref<32x128xf32, #tpu.memory_space<vmem>>, vector<1x128xf32>
    %142 = vector.broadcast %141 : vector<1x128xf32> to vector<32x128xf32>
    %143 = arith.mulf %140, %142 : vector<32x128xf32>
    %144 = arith.addf %139, %143 : vector<32x128xf32>
    %c2_87 = arith.constant 2 : index
    %c0_88 = arith.constant 0 : index
    %145 = vector.load %arg9[%c2_87, %c0_88] : memref<48x128xf32, #tpu.memory_space<vmem>>, vector<32x128xf32>
    %c11 = arith.constant 11 : index
    %c0_89 = arith.constant 0 : index
    %146 = vector.load %arg3[%c11, %c0_89] : memref<32x128xf32, #tpu.memory_space<vmem>>, vector<1x128xf32>
    %147 = vector.broadcast %146 : vector<1x128xf32> to vector<32x128xf32>
    %148 = arith.mulf %145, %147 : vector<32x128xf32>
    %149 = arith.addf %144, %148 : vector<32x128xf32>
    %c6_90 = arith.constant 6 : index
    %c0_91 = arith.constant 0 : index
    %150 = vector.load %arg9[%c6_90, %c0_91] : memref<48x128xf32, #tpu.memory_space<vmem>>, vector<32x128xf32>
    %c12_92 = arith.constant 12 : index
    %c0_93 = arith.constant 0 : index
    %151 = vector.load %arg3[%c12_92, %c0_93] : memref<32x128xf32, #tpu.memory_space<vmem>>, vector<1x128xf32>
    %152 = vector.broadcast %151 : vector<1x128xf32> to vector<32x128xf32>
    %153 = arith.mulf %150, %152 : vector<32x128xf32>
    %154 = arith.addf %149, %153 : vector<32x128xf32>
    %c7_94 = arith.constant 7 : index
    %c0_95 = arith.constant 0 : index
    %155 = vector.load %arg9[%c7_94, %c0_95] : memref<48x128xf32, #tpu.memory_space<vmem>>, vector<32x128xf32>
    %c13_96 = arith.constant 13 : index
    %c0_97 = arith.constant 0 : index
    %156 = vector.load %arg3[%c13_96, %c0_97] : memref<32x128xf32, #tpu.memory_space<vmem>>, vector<1x128xf32>
    %157 = vector.broadcast %156 : vector<1x128xf32> to vector<32x128xf32>
    %158 = arith.mulf %155, %157 : vector<32x128xf32>
    %159 = arith.addf %154, %158 : vector<32x128xf32>
    %c8_98 = arith.constant 8 : index
    %c0_99 = arith.constant 0 : index
    %160 = vector.load %arg9[%c8_98, %c0_99] : memref<48x128xf32, #tpu.memory_space<vmem>>, vector<32x128xf32>
    %c14_100 = arith.constant 14 : index
    %c0_101 = arith.constant 0 : index
    %161 = vector.load %arg3[%c14_100, %c0_101] : memref<32x128xf32, #tpu.memory_space<vmem>>, vector<1x128xf32>
    %162 = vector.broadcast %161 : vector<1x128xf32> to vector<32x128xf32>
    %163 = arith.mulf %160, %162 : vector<32x128xf32>
    %164 = arith.addf %159, %163 : vector<32x128xf32>
    %c12_102 = arith.constant 12 : index
    %c0_103 = arith.constant 0 : index
    %165 = vector.load %arg9[%c12_102, %c0_103] : memref<48x128xf32, #tpu.memory_space<vmem>>, vector<32x128xf32>
    %c15 = arith.constant 15 : index
    %c0_104 = arith.constant 0 : index
    %166 = vector.load %arg3[%c15, %c0_104] : memref<32x128xf32, #tpu.memory_space<vmem>>, vector<1x128xf32>
    %167 = vector.broadcast %166 : vector<1x128xf32> to vector<32x128xf32>
    %168 = arith.mulf %165, %167 : vector<32x128xf32>
    %169 = arith.addf %164, %168 : vector<32x128xf32>
    %c13_105 = arith.constant 13 : index
    %c0_106 = arith.constant 0 : index
    %170 = vector.load %arg9[%c13_105, %c0_106] : memref<48x128xf32, #tpu.memory_space<vmem>>, vector<32x128xf32>
    %c16 = arith.constant 16 : index
    %c0_107 = arith.constant 0 : index
    %171 = vector.load %arg3[%c16, %c0_107] : memref<32x128xf32, #tpu.memory_space<vmem>>, vector<1x128xf32>
    %172 = vector.broadcast %171 : vector<1x128xf32> to vector<32x128xf32>
    %173 = arith.mulf %170, %172 : vector<32x128xf32>
    %174 = arith.addf %169, %173 : vector<32x128xf32>
    %c14_108 = arith.constant 14 : index
    %c0_109 = arith.constant 0 : index
    %175 = vector.load %arg9[%c14_108, %c0_109] : memref<48x128xf32, #tpu.memory_space<vmem>>, vector<32x128xf32>
    %c17 = arith.constant 17 : index
    %c0_110 = arith.constant 0 : index
    %176 = vector.load %arg3[%c17, %c0_110] : memref<32x128xf32, #tpu.memory_space<vmem>>, vector<1x128xf32>
    %177 = vector.broadcast %176 : vector<1x128xf32> to vector<32x128xf32>
    %178 = arith.mulf %175, %177 : vector<32x128xf32>
    %179 = arith.addf %174, %178 : vector<32x128xf32>
    %c24 = arith.constant 24 : index
    %c0_111 = arith.constant 0 : index
    %180 = vector.load %arg3[%c24, %c0_111] : memref<32x128xf32, #tpu.memory_space<vmem>>, vector<1x128xf32>
    %c25 = arith.constant 25 : index
    %c0_112 = arith.constant 0 : index
    %181 = vector.load %arg3[%c25, %c0_112] : memref<32x128xf32, #tpu.memory_space<vmem>>, vector<1x128xf32>
    %c26 = arith.constant 26 : index
    %c0_113 = arith.constant 0 : index
    %182 = vector.load %arg3[%c26, %c0_113] : memref<32x128xf32, #tpu.memory_space<vmem>>, vector<1x128xf32>
    %c2_114 = arith.constant 2 : index
    %c0_115 = arith.constant 0 : index
    %c0_116 = arith.constant 0 : index
    %183 = vector.load %arg2[%c2_114, %c0_115, %c0_116] : memref<3x64x128xf32, #tpu.memory_space<vmem>>, vector<1x64x128xf32>
    %184 = vector.shape_cast %183 : vector<1x64x128xf32> to vector<64x128xf32>
    %185 = vector.extract_strided_slice %184 {offsets = [0, 0], sizes = [32, 128], strides = [1, 1]} : vector<64x128xf32> to vector<32x128xf32>
    %186 = vector.broadcast %180 : vector<1x128xf32> to vector<32x128xf32>
    %187 = arith.addf %179, %186 : vector<32x128xf32>
    %cst_117 = arith.constant 0.000000e+00 : f32
    %188 = vector.broadcast %cst_117 : f32 to vector<32x128xf32>
    %189 = arith.maximumf %187, %188 : vector<32x128xf32>
    %190 = arith.mulf %189, %185 : vector<32x128xf32>
    %cst_118 = arith.constant dense<0.000000e+00> : vector<128xf32>
    %191 = vector.multi_reduction <add>, %190, %cst_118 [0] : vector<32x128xf32> to vector<128xf32>
    %192 = vector.shape_cast %191 : vector<128xf32> to vector<1x128xf32>
    %cst_119 = arith.constant 2.500000e-01 : f32
    %193 = vector.broadcast %cst_119 : f32 to vector<1x128xf32>
    %194 = arith.mulf %192, %193 : vector<1x128xf32>
    %195 = vector.broadcast %194 : vector<1x128xf32> to vector<32x128xf32>
    %196 = arith.subf %190, %195 : vector<32x128xf32>
    %197 = arith.mulf %196, %185 : vector<32x128xf32>
    %198 = arith.mulf %197, %197 : vector<32x128xf32>
    %cst_120 = arith.constant dense<0.000000e+00> : vector<128xf32>
    %199 = vector.multi_reduction <add>, %198, %cst_120 [0] : vector<32x128xf32> to vector<128xf32>
    %200 = vector.shape_cast %199 : vector<128xf32> to vector<1x128xf32>
    %cst_121 = arith.constant 2.500000e-01 : f32
    %201 = vector.broadcast %cst_121 : f32 to vector<1x128xf32>
    %202 = arith.mulf %200, %201 : vector<1x128xf32>
    %cst_122 = arith.constant 9.99999974E-6 : f32
    %203 = vector.broadcast %cst_122 : f32 to vector<1x128xf32>
    %204 = arith.addf %202, %203 : vector<1x128xf32>
    %205 = math.rsqrt %204 : vector<1x128xf32>
    %206 = arith.mulf %181, %205 : vector<1x128xf32>
    %207 = vector.broadcast %206 : vector<1x128xf32> to vector<32x128xf32>
    %208 = arith.mulf %197, %207 : vector<32x128xf32>
    %209 = vector.broadcast %182 : vector<1x128xf32> to vector<32x128xf32>
    %210 = arith.addf %208, %209 : vector<32x128xf32>
    %211 = arith.mulf %210, %185 : vector<32x128xf32>
    %cst_123 = arith.constant dense<0.000000e+00> : vector<128xf32>
    %212 = vector.multi_reduction <add>, %211, %cst_123 [0] : vector<32x128xf32> to vector<128xf32>
    %213 = vector.shape_cast %212 : vector<128xf32> to vector<1x128xf32>
    %cst_124 = arith.constant 2.500000e-01 : f32
    %214 = vector.broadcast %cst_124 : f32 to vector<1x128xf32>
    %215 = arith.mulf %213, %214 : vector<1x128xf32>
    %c0_125 = arith.constant 0 : index
    %c0_126 = arith.constant 0 : index
    %216 = vector.load %arg5[%c0_125, %c0_126] : memref<128x128xf32, #tpu.memory_space<vmem>>, vector<128x128xf32>
    %cst_127 = arith.constant dense<0.000000e+00> : vector<1x128xf32>
    %217 = tpu.matmul %215, %216, %cst_127 {dimension_numbers = #tpu.dot_dimension_numbers<[1], [0], [0], [1], [0, 0, 1, 1], [], []>} : vector<1x128xf32>, vector<128x128xf32>, vector<1x128xf32> -> vector<1x128xf32>
    %c27 = arith.constant 27 : index
    %c0_128 = arith.constant 0 : index
    %218 = vector.load %arg3[%c27, %c0_128] : memref<32x128xf32, #tpu.memory_space<vmem>>, vector<1x128xf32>
    %219 = arith.addf %217, %218 : vector<1x128xf32>
    %220 = vector.shape_cast %219 : vector<1x128xf32> to vector<1x128xf32>
    %221 = vector.broadcast %220 : vector<1x128xf32> to vector<8x128xf32>
    %c0_129 = arith.constant 0 : index
    %c0_130 = arith.constant 0 : index
    %c0_131 = arith.constant 0 : index
    %222 = vector.load %arg6[%c0_129, %c0_130, %c0_131] : memref<1x8x128xf32, #tpu.memory_space<vmem>>, vector<1x8x128xf32>
    %223 = vector.shape_cast %222 : vector<1x8x128xf32> to vector<8x128xf32>
    %224 = vector.shape_cast %221 : vector<8x128xf32> to vector<1x8x128xf32>
    tpu.vector_store %arg6[%c0_129, %c0_130, %c0_131], %224 {strides = array<i32>} : memref<1x8x128xf32, #tpu.memory_space<vmem>>, vector<1x8x128xf32>,
    return
  }
  func.func @transform_0(%arg0: i32) -> (i32, i32, i32) {
    %c0_i32 = arith.constant 0 : i32
    %c0_i32_0 = arith.constant 0 : i32
    %c0_i32_1 = arith.constant 0 : i32
    return %arg0, %c0_i32, %c0_i32_0 : i32, i32, i32
  }
  func.func @transform_1(%arg0: i32) -> (i32, i32, i32) {
    %c0_i32 = arith.constant 0 : i32
    %c0_i32_0 = arith.constant 0 : i32
    %c0_i32_1 = arith.constant 0 : i32
    %c0_i32_2 = arith.constant 0 : i32
    return %c0_i32, %c0_i32_0, %c0_i32_1 : i32, i32, i32
  }
  func.func @transform_2(%arg0: i32) -> (i32, i32) {
    %c0_i32 = arith.constant 0 : i32
    %c0_i32_0 = arith.constant 0 : i32
    %c0_i32_1 = arith.constant 0 : i32
    return %c0_i32, %c0_i32_0 : i32, i32
  }
  func.func @transform_3(%arg0: i32) -> (i32, i32) {
    %c0_i32 = arith.constant 0 : i32
    %c0_i32_0 = arith.constant 0 : i32
    %c0_i32_1 = arith.constant 0 : i32
    return %c0_i32, %c0_i32_0 : i32, i32
  }
  func.func @transform_4(%arg0: i32) -> (i32, i32) {
    %c0_i32 = arith.constant 0 : i32
    %c0_i32_0 = arith.constant 0 : i32
    %c0_i32_1 = arith.constant 0 : i32
    return %c0_i32, %c0_i32_0 : i32, i32
  }
  func.func @transform_5(%arg0: i32) -> (i32, i32, i32) {
    %c0_i32 = arith.constant 0 : i32
    %c0_i32_0 = arith.constant 0 : i32
    %c0_i32_1 = arith.constant 0 : i32
    return %arg0, %c0_i32, %c0_i32_0 : i32, i32, i32
  }
}

</mosaic_0001>

<bundles_post_ra>
// kernel: convnet_forward.1
= control target key start
LH: loop header
LB: loop body
LE: loop exit
PB: predicated region body
PF: predicated region fallthrough
CT: control target
= control target key end

     0   :  { %s2237_s18 = smov 0   ;;  %s2878_s0 = inlined_call_operand.vmem [shape: f32[4,80,128], index: 0, kind: input, shape index: {}]   ;;  %s2879_s1 = inlined_call_operand.vmem [shape: f32[3,64,128], index: 1, kind: input, shape index: {}]   ;;  %s2880_s2 = inlined_call_operand.vmem [shape: f32[32,128], index: 2, kind: input, shape index: {}]   ;;  %s2881_s3 = inlined_call_operand.vmem [shape: bf16[768,128], index: 3, kind: input, shape index: {}]   ;;  %s2882_s4 = inlined_call_operand.vmem [shape: f32[128,128], index: 4, kind: input, shape index: {}]   ;;  %s2883_s5 = inlined_call_operand.vmem [shape: f32[4,8,128], index: 5, kind: output, shape index: {}]  }
   0x1 LB: > { %s1765_s19 = sadd.s32 4294967295, %s2205_s18   ;;  %p1769_p0 = scmp.ge.s32.totalorder %s2205_s18, 1  ;;  %s2205_s18 = sphi %s2237_s18, %s15_s18  }
   0x2   : > { %p187_p1 = scmp.lt.s32.totalorder %s2205_s18, 5 }
   0x4   : > { %p188_p2 = pnand %p1769_p0, %p187_p1 }
   0x5   : > { %p214_p3 = scmp.lt.s32.totalorder (!%p188_p2), %s1765_s19, 3 }
   0x6   : > { %191 = sbr.rel (%p188_p2) target bundleno = 748 (0x2ec), region = 40 }
   0xb   : > { %v2103_v0 = vld [vmem:[%s2881_s3 + $0x38] sm:$0xff]  ;;  %v2102_v2 = vld [vmem:[%s2881_s3 + $0x30] sm:$0xff]  ;;  %s2885_s19 = smov (!%p214_p3, %s1765_s19), 3  ;;  %v2101_v4 = vld [vmem:[%s2881_s3 + $0x28] sm:$0xff] }
   0xc   : > { %v2111_v1 = vld [vmem:[%s2881_s3 + $0x78] sm:$0xff]  ;;  %2144 = vmatpush.bf16.msra.mxu3 %v2103_v0  ;;  %v2110_v3 = vld [vmem:[%s2881_s3 + $0x70] sm:$0xff]  ;;  %907 = vmatpush.bf16.msra.mxu0 %v2103_v0  ;;  %s2160_s28 = smul.u32 80, %s2885_s19  ;;  %v2109_v5 = vld [vmem:[%s2881_s3 + $0x68] sm:$0xff]  ;;  %s1771_s15 = sshll.u32 %s2885_s19, 3 }
   0xd   : > { %2152 = vmatpush.bf16.msra.mxu2 %v2111_v1  ;;  %936 = vmatpush.bf16.msra.mxu1 %v2111_v1  ;;  %v2100_v17 = vld [vmem:[%s2881_s3 + $0x20] sm:$0xff]  ;;  %v2099_v27 = vld [vmem:[%s2881_s3 + $0x18] sm:$0xff]  ;;  %v2098_v37 = vld [vmem:[%s2881_s3 + $0x10] sm:$0xff]  ;;  %s222_s20 = scalar_lea.vmem %s2883_s5, %s1771_s15 }
   0xe   : > { %s2269_s10 = scalar_lea.vmem %s2878_s0, %s2160_s28  ;;  %v2108_v18 = vld [vmem:[%s2881_s3 + $0x60] sm:$0xff]  ;;  %v2107_v28 = vld [vmem:[%s2881_s3 + $0x58] sm:$0xff]  ;;  %v2106_v38 = vld [vmem:[%s2881_s3 + $0x50] sm:$0xff] }
   0xf   : > { %v227_v6 = vld [vmem:[%s2269_s10 + $0x20] sm:$0xff]  ;;  %v228_v7 = vld [vmem:[%s2269_s10 + $0x28] sm:$0xff]  ;;  %v229_v24 = vld [vmem:[%s2269_s10 + $0x30] sm:$0xff] }
  0x10   : > { %2145 = vmatpush.bf16.msra.mxu3 %v2102_v2  ;;  %908 = vmatpush.bf16.msra.mxu0 %v2102_v2  ;;  %v251_v8 = vld [vmem:[%s2269_s10 + $0x21] sm:$0xff]  ;;  %v235_v9 = vpack.c.bf16 %v227_v6, %v227_v6  ;;  %v236_v10 = vpack.c.bf16 %v228_v7, %v228_v7  ;;  %v252_v11 = vld [vmem:[%s2269_s10 + $0x29] sm:$0xff]  ;;  %v230_v25 = vld [vmem:[%s2269_s10 + $0x38] sm:$0xff]  ;;  %v237_v29 = vpack.c.bf16 %v229_v24, %v229_v24 }
  0x11   : > { %2153 = vmatpush.bf16.msra.mxu2 %v2110_v3  ;;  %937 = vmatpush.bf16.msra.mxu1 %v2110_v3  ;;  %v259_v12 = vpack.c.bf16 %v251_v8, %v251_v8  ;;  %v223_v13 = vld [vmem:[%s2269_s10] sm:$0xff]  ;;  %v224_v14 = vld [vmem:[%s2269_s10 + $0x8] sm:$0xff]  ;;  %v260_v15 = vpack.c.bf16 %v252_v11, %v252_v11  ;;  %v253_v26 = vld [vmem:[%s2269_s10 + $0x31] sm:$0xff]  ;;  %v238_v31 = vpack.c.bf16 %v230_v25, %v230_v25 }
  0x12   : > { %v247_v16 = vld [vmem:[%s2269_s10 + $0x1] sm:$0xff]  ;;  %243 = vst [vmem:[#allocation2 + $0x60] sm:$0xf] %v235_v9  ;;  %v231_v19 = vpack.c.bf16 %v223_v13, %v223_v13  ;;  %v248_v20 = vld [vmem:[%s2269_s10 + $0x9] sm:$0xff]  ;;  %v232_v21 = vpack.c.bf16 %v224_v14, %v224_v14  ;;  %v254_v30 = vld [vmem:[%s2269_s10 + $0x39] sm:$0xff]  ;;  %v261_v33 = vpack.c.bf16 %v253_v26, %v253_v26 }
  0x13   : > { %244 = vst [vmem:[#allocation2 + $0x78] sm:$0xf] %v236_v10  ;;  %v255_v22 = vpack.c.bf16 %v247_v16, %v247_v16  ;;  %v256_v23 = vpack.c.bf16 %v248_v20, %v248_v20  ;;  %v225_v32 = vld [vmem:[%s2269_s10 + $0x10] sm:$0xff]  ;;  %v226_v34 = vld [vmem:[%s2269_s10 + $0x18] sm:$0xff]  ;;  %v262_v35 = vpack.c.bf16 %v254_v30, %v254_v30  ;;  %v2097_v43 = vld [vmem:[%s2881_s3 + $0x8] sm:$0xff] }
  0x14   : > { %2146 = vmatpush.bf16.msra.mxu3 %v2101_v4  ;;  %909 = vmatpush.bf16.msra.mxu0 %v2101_v4  ;;  %267 = vst [vmem:[#allocation2 + $0x64] sm:$0xf] %v259_v12  ;;  %v249_v36 = vld [vmem:[%s2269_s10 + $0x11] sm:$0xff]  ;;  %v233_v39 = vpack.c.bf16 %v225_v32, %v225_v32  ;;  %v250_v40 = vld [vmem:[%s2269_s10 + $0x19] sm:$0xff]  ;;  %v234_v41 = vpack.c.bf16 %v226_v34, %v226_v34  ;;  %v271_v45 = vld [vmem:[%s2269_s10 + $0x6] sm:$0xff] }
  0x15   : > { %2154 = vmatpush.bf16.msra.mxu2 %v2109_v5  ;;  %938 = vmatpush.bf16.msra.mxu1 %v2109_v5  ;;  %268 = vst [vmem:[#allocation2 + $0x7c] sm:$0xf] %v260_v15  ;;  %v257_v42 = vpack.c.bf16 %v249_v36, %v249_v36  ;;  %v258_v44 = vpack.c.bf16 %v250_v40, %v250_v40  ;;  %v2105_v46 = vld [vmem:[%s2881_s3 + $0x48] sm:$0xff]  ;;  %v2096_v52 = vld [vmem:[%s2881_s3] sm:$0xff]  ;;  %v2119_v59 = vld [vmem:[%s2881_s3 + $0xb8] sm:$0xff] }
  0x16   : > { %239 = vst [vmem:[#allocation2] sm:$0xf] %v231_v19  ;;  %v272_v47 = vld [vmem:[%s2269_s10 + $0xe] sm:$0xff]  ;;  %v279_v48 = vpack.c.bf16 %v271_v45, %v271_v45  ;;  %v2104_v53 = vld [vmem:[%s2881_s3 + $0x40] sm:$0xff]  ;;  %v2127_v2 = vld [vmem:[%s2881_s3 + $0xf8] sm:$0xff] }
  0x17   : > { %240 = vst [vmem:[#allocation2 + $0x18] sm:$0xf] %v232_v21  ;;  %v295_v49 = vld [vmem:[%s2269_s10 + $0x7] sm:$0xff]  ;;  %v280_v50 = vpack.c.bf16 %v272_v47, %v272_v47  ;;  %v296_v51 = vld [vmem:[%s2269_s10 + $0xf] sm:$0xff]  ;;  %v2143_v13 = vld [vmem:[%s2881_s3 + $0x178] sm:$0xff] }
  0x18   : > { %2147 = vmatpush.bf16.msra.mxu3 %v2100_v17  ;;  %910 = vmatpush.bf16.msra.mxu0 %v2100_v17  ;;  %263 = vst [vmem:[#allocation2 + $0x4] sm:$0xf] %v255_v22  ;;  %v303_v57 = vpack.c.bf16 %v295_v49, %v295_v49  ;;  %v304_v60 = vpack.c.bf16 %v296_v51, %v296_v51  ;;  %v319_v61 = vld [vmem:[%s2269_s10 + $0xc] sm:$0xff]  ;;  %v320_v63 = vld [vmem:[%s2269_s10 + $0x14] sm:$0xff]  ;;  %v274_v22 = vld [vmem:[%s2269_s10 + $0x1e] sm:$0xff] }
  0x19   : > { %2155 = vmatpush.bf16.msra.mxu2 %v2108_v18  ;;  %939 = vmatpush.bf16.msra.mxu1 %v2108_v18  ;;  %264 = vst [vmem:[#allocation2 + $0x1c] sm:$0xf] %v256_v23  ;;  %v1822_v54 = vld [vmem:[#allocation2 + $0x60] sm:$0xf]  ;;  %v327_v0 = vpack.c.bf16 %v319_v61, %v319_v61  ;;  %v343_v1 = vld [vmem:[%s2269_s10 + $0xd] sm:$0xff]  ;;  %v328_v4 = vpack.c.bf16 %v320_v63, %v320_v63  ;;  %v344_v5 = vld [vmem:[%s2269_s10 + $0x15] sm:$0xff] }
  0x1a   : > { %245 = vst [vmem:[#allocation2 + $0x90] sm:$0xf] %v237_v29  ;;  %v2087_v55 = vld [vmem:[#allocation2 + $0x74] sm:$0xf0]  ;;  %v351_v8 = vpack.c.bf16 %v343_v1, %v343_v1  ;;  %v352_v11 = vpack.c.bf16 %v344_v5, %v344_v5  ;;  %v2118_v16 = vld [vmem:[%s2881_s3 + $0xb0] sm:$0xff]  ;;  %v2117_v20 = vld [vmem:[%s2881_s3 + $0xa8] sm:$0xff]  ;;  %v282_v25 = vpack.c.bf16 %v274_v22, %v274_v22 }
  0x1b   : > { %246 = vst [vmem:[#allocation2 + $0xa8] sm:$0xf] %v238_v31  ;;  %v2084_v56 = vld [vmem:[#allocation2 + $0x64] sm:$0xf]  ;;  %v1823_v9 = vor.u32 %v2087_v55, %v1822_v54  ;;  %v2135_v14 = vld [vmem:[%s2881_s3 + $0x138] sm:$0xff]  ;;  %v2126_v17 = vld [vmem:[%s2881_s3 + $0xf0] sm:$0xff] }
  0x1c   : > { %2148 = vmatpush.bf16.msra.mxu3 %v2099_v27  ;;  %911 = vmatpush.bf16.msra.mxu0 %v2099_v27  ;;  %269 = vst [vmem:[#allocation2 + $0x94] sm:$0xf] %v261_v33  ;;  %v1824_v58 = vld [vmem:[#allocation2 + $0x78] sm:$0xf0]  ;;  %v2134_v18 = vld [vmem:[%s2881_s3 + $0x130] sm:$0xff]  ;;  %v2125_v23 = vld [vmem:[%s2881_s3 + $0xe8] sm:$0xff] }
  0x1d   : > { %2156 = vmatpush.bf16.msra.mxu2 %v2107_v28  ;;  %940 = vmatpush.bf16.msra.mxu1 %v2107_v28  ;;  %270 = vst [vmem:[#allocation2 + $0xac] sm:$0xf] %v262_v35  ;;  %v1774_v62 = vld [vmem:[#allocation2] sm:$0xf]  ;;  %v1827_v10 = vor.u32 %v2084_v56, %v1824_v58  ;;  %v2142_v19 = vld [vmem:[%s2881_s3 + $0x170] sm:$0xff]  ;;  %v2133_v28 = vld [vmem:[%s2881_s3 + $0x128] sm:$0xff] }
  0x1e   : > { %241 = vst [vmem:[#allocation2 + $0x30] sm:$0xf] %v233_v39  ;;  %v2075_v3 = vld [vmem:[#allocation2 + $0x14] sm:$0xf0]  ;;  %v298_v27 = vld [vmem:[%s2269_s10 + $0x1f] sm:$0xff]  ;;  %v2141_v31 = vld [vmem:[%s2881_s3 + $0x168] sm:$0xff] }
  0x1f   : > { %242 = vst [vmem:[#allocation2 + $0x48] sm:$0xf] %v234_v41  ;;  %v2072_v6 = vld [vmem:[#allocation2 + $0x4] sm:$0xf]  ;;  %v1775_v12 = vor.u32 %v2075_v3, %v1774_v62  ;;  %v273_v21 = vld [vmem:[%s2269_s10 + $0x16] sm:$0xff]  ;;  %v306_v30 = vpack.c.bf16 %v298_v27, %v298_v27  ;;  %v2121_v3 = vld [vmem:[%s2881_s3 + $0xc8] sm:$0xff] }
  0x20   : > { %2149 = vmatpush.bf16.msra.mxu3 %v2098_v37  ;;  %912 = vmatpush.bf16.msra.mxu0 %v2098_v37  ;;  %265 = vst [vmem:[#allocation2 + $0x34] sm:$0xf] %v257_v42  ;;  %v1776_v7 = vld [vmem:[#allocation2 + $0x18] sm:$0xf0]  ;;  %v281_v24 = vpack.c.bf16 %v273_v21, %v273_v21  ;;  %v322_v33 = vld [vmem:[%s2269_s10 + $0x24] sm:$0xff]  ;;  %v2122_v61 = vld [vmem:[%s2881_s3 + $0xd0] sm:$0xff] }
  0x21   : > { %2157 = vmatpush.bf16.msra.mxu2 %v2106_v38  ;;  %941 = vmatpush.bf16.msra.mxu1 %v2106_v38  ;;  %266 = vst [vmem:[#allocation2 + $0x4c] sm:$0xf] %v258_v44  ;;  %v1779_v15 = vor.u32 %v2072_v6, %v1776_v7  ;;  %v297_v26 = vld [vmem:[%s2269_s10 + $0x17] sm:$0xff]  ;;  %v2116_v34 = vld [vmem:[%s2881_s3 + $0xa0] sm:$0xff]  ;;  %v330_v37 = vpack.c.bf16 %v322_v33, %v322_v33  ;;  %v1846_v38 = vld [vmem:[#allocation2 + $0x90] sm:$0xf] }
  0x22   : > { %287 = vst [vmem:[#allocation2 + $0x8] sm:$0xf] %v279_v48  ;;  %v305_v29 = vpack.c.bf16 %v297_v26, %v297_v26  ;;  %v321_v32 = vld [vmem:[%s2269_s10 + $0x1c] sm:$0xff]  ;;  %v2093_v39 = vld [vmem:[#allocation2 + $0xa4] sm:$0xf0]  ;;  %v2130_v62 = vld [vmem:[%s2881_s3 + $0x110] sm:$0xff] }
  0x23   : > { %288 = vst [vmem:[#allocation2 + $0x20] sm:$0xf] %v280_v50  ;;  %v2124_v35 = vld [vmem:[%s2881_s3 + $0xe0] sm:$0xff]  ;;  %v329_v36 = vpack.c.bf16 %v321_v32, %v321_v32  ;;  %v2090_v40 = vld [vmem:[#allocation2 + $0x94] sm:$0xf]  ;;  %v2115_v50 = vld [vmem:[%s2881_s3 + $0x98] sm:$0xff]  ;;  %v1847_v54 = vor.u32 %v2093_v39, %v1846_v38 }
  0x24   : > { %2150 = vmatpush.bf16.msra.mxu3 %v2097_v43  ;;  %913 = vmatpush.bf16.msra.mxu0 %v2097_v43  ;;  %311 = vst [vmem:[#allocation2 + $0xc] sm:$0xf] %v303_v57  ;;  %v1848_v41 = vld [vmem:[#allocation2 + $0xa8] sm:$0xf0]  ;;  %v2140_v42 = vld [vmem:[%s2881_s3 + $0x160] sm:$0xff]  ;;  %v2123_v51 = vld [vmem:[%s2881_s3 + $0xd8] sm:$0xff] }
  0x25   : > { %2158 = vmatpush.bf16.msra.mxu2 %v2105_v46  ;;  %942 = vmatpush.bf16.msra.mxu1 %v2105_v46  ;;  %312 = vst [vmem:[#allocation2 + $0x24] sm:$0xf] %v304_v60  ;;  %v345_v43 = vld [vmem:[%s2269_s10 + $0x1d] sm:$0xff]  ;;  %v346_v44 = vld [vmem:[%s2269_s10 + $0x25] sm:$0xff]  ;;  %v1798_v46 = vld [vmem:[#allocation2 + $0x30] sm:$0xf]  ;;  %v1851_v55 = vor.u32 %v2090_v40, %v1848_v41 }
  0x26   : > { %335 = vst [vmem:[#allocation2 + $0x10] sm:$0xf] %v327_v0  ;;  %v2132_v45 = vld [vmem:[%s2881_s3 + $0x120] sm:$0xff]  ;;  %v2081_v47 = vld [vmem:[#allocation2 + $0x44] sm:$0xf0]  ;;  %v353_v48 = vpack.c.bf16 %v345_v43, %v345_v43  ;;  %v354_v49 = vpack.c.bf16 %v346_v44, %v346_v44  ;;  %v2139_v57 = vld [vmem:[%s2881_s3 + $0x158] sm:$0xff] }
  0x27   : > { %336 = vst [vmem:[#allocation2 + $0x28] sm:$0xf] %v328_v4  ;;  %v1799_v56 = vor.u32 %v2081_v47, %v1798_v46  ;;  %v2131_v58 = vld [vmem:[%s2881_s3 + $0x118] sm:$0xff]  ;;  %v2114_v60 = vld [vmem:[%s2881_s3 + $0x90] sm:$0xff]  ;;  %v2113_v0 = vld [vmem:[%s2881_s3 + $0x88] sm:$0xff] }
  0x28   : > { %2151 = vmatpush.bf16.msra.mxu3 %v2096_v52  ;;  %914 = vmatpush.bf16.msra.mxu0 %v2096_v52  ;;  %359 = vst [vmem:[#allocation2 + $0x14] sm:$0xf] %v351_v8  ;;  %v2078_v52 = vld [vmem:[#allocation2 + $0x34] sm:$0xf]  ;;  %v275_v1 = vld [vmem:[%s2269_s10 + $0x26] sm:$0xff]  ;;  %v325_v44 = vld [vmem:[%s2269_s10 + $0x3c] sm:$0xff] }
  0x29   : > { %2159 = vmatpush.bf16.msra.mxu2 %v2104_v53  ;;  %943 = vmatpush.bf16.msra.mxu1 %v2104_v53  ;;  %360 = vst [vmem:[#allocation2 + $0x2c] sm:$0xf] %v352_v11  ;;  %v1800_v53 = vld [vmem:[#allocation2 + $0x48] sm:$0xf0]  ;;  %v2138_v63 = vld [vmem:[%s2881_s3 + $0x150] sm:$0xff]  ;;  %v283_v4 = vpack.c.bf16 %v275_v1, %v275_v1  ;;  %v2128_v21 = vld [vmem:[%s2881_s3 + $0x100] sm:$0xff]  ;;  %v333_v46 = vpack.c.bf16 %v325_v44, %v325_v44 }
  0x2a   : > { %289 = vst [vmem:[#allocation2 + $0x38] sm:$0xf] %v281_v24  ;;  %v299_v6 = vld [vmem:[%s2269_s10 + $0x27] sm:$0xff]  ;;  %v300_v7 = vld [vmem:[%s2269_s10 + $0x2f] sm:$0xff]  ;;  %v301_v40 = vld [vmem:[%s2269_s10 + $0x37] sm:$0xff] }
  0x2b   : > { %925 = vmatmul.bf16.vlgmr.msra.gmra.mxu3 %v1823_v9  ;;  %915 = vmatmul.bf16.vlgmr.msra.gmra.mxu0 %v1775_v12  ;;  %290 = vst [vmem:[#allocation2 + $0x50] sm:$0xf] %v282_v25  ;;  %v307_v8 = vpack.c.bf16 %v299_v6, %v299_v6  ;;  %v308_v9 = vpack.c.bf16 %v300_v7, %v300_v7  ;;  %v323_v11 = vld [vmem:[%s2269_s10 + $0x2c] sm:$0xff]  ;;  %v324_v12 = vld [vmem:[%s2269_s10 + $0x34] sm:$0xff]  ;;  %v1782_v22 = vld [vmem:[#allocation2 + $0x8] sm:$0xf] }
  0x2c   : > { %994 = vmatpush.bf16.msrb.mxu3 %v2127_v2  ;;  %954 = vmatmul.bf16.vlgmr.msra.gmra.mxu2 %v1827_v10  ;;  %313 = vst [vmem:[#allocation2 + $0x3c] sm:$0xf] %v305_v29  ;;  %v276_v2 = vld [vmem:[%s2269_s10 + $0x2e] sm:$0xff]  ;;  %v1784_v27 = vld [vmem:[#allocation2 + $0x20] sm:$0xf0] }
  0x2d   : > { %965 = vmatpush.bf16.msrb.mxu2 %v2119_v59  ;;  %1052 = vmatpush.bf16.msrb.mxu1 %v2143_v13  ;;  %314 = vst [vmem:[#allocation2 + $0x54] sm:$0xf] %v306_v30  ;;  %v1803_v59 = vor.u32 %v2078_v52, %v1800_v53  ;;  %v284_v5 = vpack.c.bf16 %v276_v2, %v276_v2  ;;  %v2137_v10 = vld [vmem:[%s2881_s3 + $0x148] sm:$0xff]  ;;  %v302_v41 = vld [vmem:[%s2269_s10 + $0x3f] sm:$0xff] }
  0x2e   : > { %1023 = vmatpush.bf16.msrb.mxu0 %v2135_v14  ;;  %944 = vmatmul.bf16.vlgmr.msra.gmra.mxu1 %v1779_v15  ;;  %337 = vst [vmem:[#allocation2 + $0x40] sm:$0xf] %v329_v36  ;;  %v2129_v13 = vld [vmem:[%s2881_s3 + $0x108] sm:$0xff]  ;;  %v2112_v14 = vld [vmem:[%s2881_s3 + $0x80] sm:$0xff]  ;;  %v277_v36 = vld [vmem:[%s2269_s10 + $0x36] sm:$0xff]  ;;  %v310_v43 = vpack.c.bf16 %v302_v41, %v302_v41 }
  0x2f   : > { %338 = vst [vmem:[#allocation2 + $0x58] sm:$0xf] %v330_v37  ;;  %v2120_v15 = vld [vmem:[%s2881_s3 + $0xc0] sm:$0xff]  ;;  %v2073_v26 = vld [vmem:[#allocation2 + $0xc] sm:$0xf]  ;;  %v285_v38 = vpack.c.bf16 %v277_v36, %v277_v36 }
  0x30   : > { %995 = vmatpush.bf16.msrb.mxu3 %v2126_v17  ;;  %361 = vst [vmem:[#allocation2 + $0x44] sm:$0xf] %v353_v48  ;;  %v332_v17 = vpack.c.bf16 %v324_v12, %v324_v12  ;;  %v2077_v29 = vld [vmem:[#allocation2 + $0x24] sm:$0xf0]  ;;  %v2074_v30 = vld [vmem:[#allocation2 + $0x14] sm:$0xf]  ;;  %v1787_v33 = vor.u32 %v2073_v26, %v1784_v27 }
  0x31   : > { %966 = vmatpush.bf16.msrb.mxu2 %v2118_v16  ;;  %1053 = vmatpush.bf16.msrb.mxu1 %v2142_v19  ;;  %362 = vst [vmem:[#allocation2 + $0x5c] sm:$0xf] %v354_v49  ;;  %v331_v16 = vpack.c.bf16 %v323_v11, %v323_v11  ;;  %v347_v19 = vld [vmem:[%s2269_s10 + $0x2d] sm:$0xff]  ;;  %v278_v37 = vld [vmem:[%s2269_s10 + $0x3e] sm:$0xff] }
  0x32   : > { %1024 = vmatpush.bf16.msrb.mxu0 %v2134_v18  ;;  %291 = vst [vmem:[#allocation2 + $0x68] sm:$0xf] %v283_v4  ;;  %v2136_v18 = vld [vmem:[%s2881_s3 + $0x140] sm:$0xff]  ;;  %v355_v24 = vpack.c.bf16 %v347_v19, %v347_v19  ;;  %v286_v39 = vpack.c.bf16 %v278_v37, %v278_v37 }
  0x33   : > { %292 = vst [vmem:[#allocation2 + $0x80] sm:$0xf] %v284_v5  ;;  %v349_v48 = vld [vmem:[%s2269_s10 + $0x3d] sm:$0xff]  ;;  %v350_v49 = vld [vmem:[%s2269_s10 + $0x45] sm:$0xff] }
  0x34   : > { %996 = vmatpush.bf16.msrb.mxu3 %v2125_v23  ;;  %315 = vst [vmem:[#allocation2 + $0x6c] sm:$0xf] %v307_v8  ;;  %v2076_v23 = vld [vmem:[#allocation2 + $0x1c] sm:$0xf0]  ;;  %v357_v52 = vpack.c.bf16 %v349_v48, %v349_v48  ;;  %v358_v53 = vpack.c.bf16 %v350_v49, %v350_v49 }
  0x35   : > { %967 = vmatpush.bf16.msrb.mxu2 %v2117_v20  ;;  %1054 = vmatpush.bf16.msrb.mxu1 %v2141_v31  ;;  %v348_v20 = vld [vmem:[%s2269_s10 + $0x35] sm:$0xff]  ;;  %316 = vst [vmem:[#allocation2 + $0x84] sm:$0xf] %v308_v9  ;;  %v1792_v31 = vld [vmem:[#allocation2 + $0x28] sm:$0xf0]  ;;  %v1783_v32 = vor.u32 %v2076_v23, %v1782_v22 }
  0x36   : > { %1025 = vmatpush.bf16.msrb.mxu0 %v2133_v28  ;;  %v356_v25 = vpack.c.bf16 %v348_v20, %v348_v20  ;;  %339 = vst [vmem:[#allocation2 + $0x70] sm:$0xf] %v331_v16  ;;  %v1790_v28 = vld [vmem:[#allocation2 + $0x10] sm:$0xf] }
  0x37   : > { %340 = vst [vmem:[#allocation2 + $0x88] sm:$0xf] %v332_v17 }
  0x38   : > { %997 = vmatpush.bf16.msrb.mxu3 %v2124_v35  ;;  %363 = vst [vmem:[#allocation2 + $0x74] sm:$0xf] %v355_v24  ;;  %v1795_v35 = vor.u32 %v2074_v30, %v1792_v31  ;;  %v2448_v24 = vld [vmem:[%s2880_s2 + $0x12] ss:$0 sm:$0xff] }
  0x39   : > { %968 = vmatpush.bf16.msrb.mxu2 %v2116_v34  ;;  %1055 = vmatpush.bf16.msrb.mxu1 %v2140_v42  ;;  %364 = vst [vmem:[#allocation2 + $0x8c] sm:$0xf] %v356_v25  ;;  %v1791_v34 = vor.u32 %v2077_v29, %v1790_v28  ;;  %v309_v42 = vpack.c.bf16 %v301_v40, %v301_v40 }
  0x3a   : > { %1026 = vmatpush.bf16.msrb.mxu0 %v2132_v45  ;;  %293 = vst [vmem:[#allocation2 + $0x98] sm:$0xf] %v285_v38  ;;  %v326_v45 = vld [vmem:[%s2269_s10 + $0x44] sm:$0xff]  ;;  %v2088_v1 = vld [vmem:[#allocation2 + $0x7c] sm:$0xf0] }
  0x3b   : > { %930 = vmatmul.bf16.gmra.mxu3 %v1847_v54  ;;  %920 = vmatmul.bf16.gmra.mxu0 %v1799_v56  ;;  %294 = vst [vmem:[#allocation2 + $0xb0] sm:$0xf] %v286_v39  ;;  %v334_v47 = vpack.c.bf16 %v326_v45, %v326_v45  ;;  %v2079_v54 = vld [vmem:[#allocation2 + $0x3c] sm:$0xf]  ;;  %v1814_v56 = vld [vmem:[#allocation2 + $0x40] sm:$0xf] }
  0x3c   : > { %998 = vmatpush.bf16.msrb.mxu3 %v2123_v51  ;;  %959 = vmatmul.bf16.gmra.mxu2 %v1851_v55  ;;  %317 = vst [vmem:[#allocation2 + $0x9c] sm:$0xf] %v309_v42  ;;  %v2082_v51 = vld [vmem:[#allocation2 + $0x4c] sm:$0xf0]  ;;  %v1808_v55 = vld [vmem:[#allocation2 + $0x50] sm:$0xf0] }
  0x3d   : > { %969 = vmatpush.bf16.msrb.mxu2 %v2115_v50  ;;  %1056 = vmatpush.bf16.msrb.mxu1 %v2139_v57  ;;  %v1806_v50 = vld [vmem:[#allocation2 + $0x38] sm:$0xf]  ;;  %318 = vst [vmem:[#allocation2 + $0xb4] sm:$0xf] %v310_v43  ;;  %v2085_v2 = vld [vmem:[#allocation2 + $0x6c] sm:$0xf] }
  0x3e   : > { %1027 = vmatpush.bf16.msrb.mxu0 %v2131_v58  ;;  %949 = vmatmul.bf16.gmra.mxu1 %v1803_v59  ;;  %341 = vst [vmem:[#allocation2 + $0xa0] sm:$0xf] %v333_v46  ;;  %v2083_v57 = vld [vmem:[#allocation2 + $0x54] sm:$0xf0]  ;;  %v2080_v58 = vld [vmem:[#allocation2 + $0x44] sm:$0xf] }
  0x3f   : > { %342 = vst [vmem:[#allocation2 + $0xb8] sm:$0xf] %v334_v47  ;;  %v1816_v59 = vld [vmem:[#allocation2 + $0x58] sm:$0xf0]  ;;  %v1838_v4 = vld [vmem:[#allocation2 + $0x70] sm:$0xf] }
  0x40   : > { %999 = vmatpush.bf16.msrb.mxu3 %v2122_v61  ;;  %365 = vst [vmem:[#allocation2 + $0xa4] sm:$0xf] %v357_v52  ;;  %v1811_v61 = vor.u32 %v2079_v54, %v1808_v55  ;;  %v2089_v5 = vld [vmem:[#allocation2 + $0x84] sm:$0xf0]  ;;  %v2086_v6 = vld [vmem:[#allocation2 + $0x74] sm:$0xf] }
  0x41   : > { %970 = vmatpush.bf16.msrb.mxu2 %v2114_v60  ;;  %1057 = vmatpush.bf16.msrb.mxu1 %v2138_v63  ;;  %v1807_v60 = vor.u32 %v2082_v51, %v1806_v50  ;;  %366 = vst [vmem:[#allocation2 + $0xbc] sm:$0xf] %v358_v53  ;;  %v1819_v63 = vor.u32 %v2080_v58, %v1816_v59  ;;  %v1840_v7 = vld [vmem:[#allocation2 + $0x88] sm:$0xf0]  ;;  %v1854_v12 = vld [vmem:[#allocation2 + $0x98] sm:$0xf] }
  0x42   : > { %1028 = vmatpush.bf16.msrb.mxu0 %v2130_v62  ;;  %v1815_v62 = vor.u32 %v2083_v57, %v1814_v56  ;;  %v1843_v11 = vor.u32 %v2086_v6, %v1840_v7 }
  0x44   : > { %1000 = vmatpush.bf16.msrb.mxu3 %v2121_v3  ;;  %v1832_v3 = vld [vmem:[#allocation2 + $0x80] sm:$0xf0] }
  0x45   : > { %971 = vmatpush.bf16.msrb.mxu2 %v2113_v0  ;;  %1058 = vmatpush.bf16.msrb.mxu1 %v2137_v10  ;;  %v1830_v0 = vld [vmem:[#allocation2 + $0x68] sm:$0xf]  ;;  %v1835_v9 = vor.u32 %v2085_v2, %v1832_v3  ;;  %v1839_v10 = vor.u32 %v2089_v5, %v1838_v4  ;;  %v1862_v16 = vld [vmem:[#allocation2 + $0xa0] sm:$0xf] }
  0x46   : > { %1029 = vmatpush.bf16.msrb.mxu0 %v2129_v13  ;;  %v1831_v8 = vor.u32 %v2088_v1, %v1830_v0  ;;  %v2094_v13 = vld [vmem:[#allocation2 + $0xac] sm:$0xf0]  ;;  %v2095_v17 = vld [vmem:[#allocation2 + $0xb4] sm:$0xf0] }
  0x47   : > { %v1855_v20 = vor.u32 %v2094_v13, %v1854_v12  ;;  %v1863_v22 = vor.u32 %v2095_v17, %v1862_v16 }
  0x48   : > { %1001 = vmatpush.bf16.msrb.mxu3 %v2120_v15  ;;  %v1856_v15 = vld [vmem:[#allocation2 + $0xb0] sm:$0xf0]  ;;  %v1864_v19 = vld [vmem:[#allocation2 + $0xb8] sm:$0xf0] }
  0x49   : > { %972 = vmatpush.bf16.msrb.mxu2 %v2112_v14  ;;  %1059 = vmatpush.bf16.msrb.mxu1 %v2136_v18  ;;  %v2091_v14 = vld [vmem:[#allocation2 + $0x9c] sm:$0xf]  ;;  %v2092_v18 = vld [vmem:[#allocation2 + $0xa4] sm:$0xf] }
  0x4a   : > { %1030 = vmatpush.bf16.msrb.mxu0 %v2128_v21  ;;  %v1859_v21 = vor.u32 %v2091_v14, %v1856_v15  ;;  %v1867_v23 = vor.u32 %v2092_v18, %v1864_v19 }
  0x4b   : > { %1002 = vmatmul.bf16.vlgmr.msrb.gmra.mxu3 %v1787_v33 }
  0x4c   : > { %973 = vmatmul.bf16.vlgmr.msrb.gmra.mxu2 %v1783_v32 }
  0x4d   : > { %1031 = vmatmul.bf16.vlgmr.msrb.gmra.mxu0 %v1791_v34 }
  0x4e   : > { %1060 = vmatmul.bf16.vlgmr.msrb.gmra.mxu1 %v1795_v35 }
  0x5b   : > { %1007 = vmatmul.bf16.gmra.mxu3 %v1811_v61 }
  0x5c   : > { %978 = vmatmul.bf16.gmra.mxu2 %v1807_v60 }
  0x5d   : > { %1036 = vmatmul.bf16.gmra.mxu0 %v1815_v62 }
  0x5e   : > { %1065 = vmatmul.bf16.gmra.mxu1 %v1819_v63 }
  0x6b   : > { %1012 = vmatmul.bf16.gmra.mxu3 %v1835_v9 }
  0x6c   : > { %983 = vmatmul.bf16.gmra.mxu2 %v1831_v8 }
  0x6d   : > { %1041 = vmatmul.bf16.gmra.mxu0 %v1839_v10 }
  0x6e   : > { %1070 = vmatmul.bf16.gmra.mxu1 %v1843_v11 }
  0x7b   : > { %1017 = vmatmul.bf16.gmra.mxu3 %v1859_v21 }
  0x7c   : > { %988 = vmatmul.bf16.gmra.mxu2 %v1855_v20 }
  0x7d   : > { %1046 = vmatmul.bf16.gmra.mxu0 %v1863_v22 }
  0x7e   : > { %1075 = vmatmul.bf16.gmra.mxu1 %v1867_v23 }
  0xa8   : > { %v916_v25 = vpop.f32.mrf.mxu0 }
  0xa9   : > { %v917_v26 = vadd.f32 %v2448_v24, %v916_v25 }
  0xab   : > { %v945_v27 = vpop.f32.mrf.mxu1 }
  0xac   : > { %v946_v28 = vadd.f32 %v945_v27, %v917_v26  ;;  %v2470_v27 = vld [vmem:[%s2879_s1 + $0x8] sm:$0xff] }
  0xae   : > { %v926_v29 = vpop.f32.mrf.mxu3 }
  0xaf   : > { %v955_v30 = vpop.f32.mrf.mxu2  ;;  %v927_v31 = vadd.f32 %v2448_v24, %v926_v29 }
  0xb0   : > { %v918_v33 = vpop.f32.mrf.mxu0 }
  0xb1   : > { %v2452_v32 = vadd.f32 %v955_v30, %v927_v31  ;;  %v919_v57 = vadd.f32 %v2448_v24, %v918_v33 }
  0xb3   : > { %v947_v34 = vpop.f32.mrf.mxu1 }
  0xb4   : > { %v948_v61 = vadd.f32 %v947_v34, %v919_v57  ;;  %v2476_v34 = vld [vmem:[%s2879_s1] sm:$0xff] }
  0xb6   : > { %v928_v35 = vpop.f32.mrf.mxu3 }
  0xb7   : > { %v957_v36 = vpop.f32.mrf.mxu2  ;;  %v929_v37 = vadd.f32 %v2448_v24, %v928_v35  ;;  %v2481_v35 = vld [vmem:[%s2879_s1 + $0x10] sm:$0xff] }
  0xb8   : > { %v921_v39 = vpop.f32.mrf.mxu0 }
  0xb9   : > { %v2455_v38 = vadd.f32 %v957_v36, %v929_v37  ;;  %v922_v58 = vadd.f32 %v2448_v24, %v921_v39 }
  0xbb   : > { %v950_v40 = vpop.f32.mrf.mxu1 }
  0xbc   : > { %v951_v62 = vadd.f32 %v950_v40, %v922_v58  ;;  %v2489_v40 = vld [vmem:[%s2879_s1 + $0x18] sm:$0xff] }
  0xbe   : > { %v931_v41 = vpop.f32.mrf.mxu3 }
  0xbf   : > { %v960_v42 = vpop.f32.mrf.mxu2  ;;  %v932_v43 = vadd.f32 %v2448_v24, %v931_v41 }
  0xc0   : > { %v923_v45 = vpop.f32.mrf.mxu0 }
  0xc1   : > { %v2458_v44 = vadd.f32 %v960_v42, %v932_v43  ;;  %v924_v4 = vadd.f32 %v2448_v24, %v923_v45 }
  0xc3   : > { %v952_v46 = vpop.f32.mrf.mxu1 }
  0xc4   : > { %v953_v10 = vadd.f32 %v952_v46, %v924_v4 }
  0xc6   : > { %v2460_v47 = vpop.f32.mrf.mxu3 }
  0xc7   : > { %v2462_v48 = vpop.f32.mrf.mxu2  ;;  %v934_v4 = vadd.f32 %v2448_v24, %v2460_v47 }
  0xca   : > { %v1032_v49 = vpop.f32.mrf.mxu0 }
  0xcb   : > { %v1061_v50 = vpop.f32.mrf.mxu1 }
  0xce   : > { %v1003_v52 = vpop.f32.mrf.mxu3 }
  0xcf   : > { %v974_v51 = vpop.f32.mrf.mxu2 }
  0xd0   : > { %v975_v2 = vadd.f32 %v974_v51, %v946_v28 }
  0xd2   : > { %v1034_v53 = vpop.f32.mrf.mxu0  ;;  %v1004_v7 = vadd.f32 %v1003_v52, %v975_v2 }
  0xd3   : > { %v1063_v54 = vpop.f32.mrf.mxu1 }
  0xd4   : > { %v1033_v14 = vadd.f32 %v1032_v49, %v1004_v7 }
  0xd6   : > { %v1005_v56 = vpop.f32.mrf.mxu3  ;;  %v1062_v19 = vadd.f32 %v1061_v50, %v1033_v14  ;;  %v2505_v50 = vld [vmem:[%s2879_s1 + $0x20] sm:$0xff] }
  0xd7   : > { %v976_v55 = vpop.f32.mrf.mxu2 }
  0xd8   : > { %v977_v63 = vadd.f32 %v976_v55, %v948_v61  ;;  %v1081_v30 = vmax.f32 %v1062_v19, 0.0 }
  0xda   : > { %v1037_v59 = vpop.f32.mrf.mxu0  ;;  %v1006_v5 = vadd.f32 %v1005_v56, %v977_v63  ;;  %v2514_v63 = vld [vmem:[%s2879_s1 + $0x28] sm:$0xff] }
  0xdb   : > { %v1066_v60 = vpop.f32.mrf.mxu1 }
  0xdc   : > { %v1035_v11 = vadd.f32 %v1034_v53, %v1006_v5 }
  0xde   : > { %v1008_v1 = vpop.f32.mrf.mxu3  ;;  %v1064_v17 = vadd.f32 %v1063_v54, %v1035_v11 }
  0xdf   : > { %v979_v0 = vpop.f32.mrf.mxu2 }
  0xe0   : > { %v980_v3 = vadd.f32 %v979_v0, %v951_v62  ;;  %v1082_v23 = vmax.f32 %v1064_v17, 0.0 }
  0xe2   : > { %v1039_v6 = vpop.f32.mrf.mxu0  ;;  %v1009_v8 = vadd.f32 %v1008_v1, %v980_v3  ;;  %v2484_v36 = vmul.f32 %v1082_v23, %v2470_v27 }
  0xe3   : > { %v1068_v9 = vpop.f32.mrf.mxu1 }
  0xe4   : > { %v1038_v15 = vadd.f32 %v1037_v59, %v1009_v8 }
  0xe6   : > { %v1010_v13 = vpop.f32.mrf.mxu3  ;;  %v1067_v20 = vadd.f32 %v1066_v60, %v1038_v15 }
  0xe7   : > { %v981_v12 = vpop.f32.mrf.mxu2 }
  0xe8   : > { %v982_v16 = vadd.f32 %v981_v12, %v953_v10  ;;  %v1083_v31 = vmax.f32 %v1067_v20, 0.0  ;;  %v963_v10 = vadd.f32 %v2462_v48, %v934_v4  ;;  %v2524_v12 = vld [vmem:[%s2879_s1 + $0x30] sm:$0xff]  ;;  %v2530_v48 = vld [vmem:[%s2879_s1 + $0x38] sm:$0xff] }
  0xea   : > { %v1011_v18 = vadd.f32 %v1010_v13, %v982_v16  ;;  %v1042_v22 = vpop.f32.mrf.mxu0  ;;  %v2495_v41 = vmul.f32 %v1083_v31, %v2481_v35 }
  0xeb   : > { %v1071_v26 = vpop.f32.mrf.mxu1 }
  0xec   : > { %v1040_v21 = vadd.f32 %v1039_v6, %v1011_v18 }
  0xee   : > { %v1069_v25 = vadd.f32 %v1068_v9, %v1040_v21  ;;  %v1013_v29 = vpop.f32.mrf.mxu3 }
  0xef   : > { %v984_v28 = vpop.f32.mrf.mxu2 }
  0xf0   : > { %v985_v33 = vadd.f32 %v984_v28, %v2452_v32  ;;  %v1084_v37 = vmax.f32 %v1069_v25, 0.0  ;;  %v2492_v32 = vmul.f32 %v1081_v30, %v2476_v34 }
  0xf2   : > { %v1014_v39 = vadd.f32 %v1013_v29, %v985_v33  ;;  %v1097_v43 = vadd.f32 %v2484_v36, %v2492_v32  ;;  %v2500_v45 = vmul.f32 %v1084_v37, %v2489_v40  ;;  %v1044_v49 = vpop.f32.mrf.mxu0 }
  0xf3   : > { %v1073_v56 = vpop.f32.mrf.mxu1 }
  0xf4   : > { %v1043_v42 = vadd.f32 %v1042_v22, %v1014_v39  ;;  %v1098_v53 = vadd.f32 %v1097_v43, %v2495_v41 }
  0xf6   : > { %v1072_v46 = vadd.f32 %v1071_v26, %v1043_v42  ;;  %v1015_v52 = vpop.f32.mrf.mxu3  ;;  %v1099_v57 = vadd.f32 %v1098_v53, %v2500_v45 }
  0xf7   : > { %v986_v51 = vpop.f32.mrf.mxu2 }
  0xf8   : > { %v1085_v54 = vmax.f32 %v1072_v46, 0.0  ;;  %v987_v55 = vadd.f32 %v986_v51, %v2455_v38 }
  0xfa   : > { %v1093_v58 = vmul.f32 %v1085_v54, %v2505_v50  ;;  %v1016_v59 = vadd.f32 %v1015_v52, %v987_v55  ;;  %v1047_v38 = vpop.f32.mrf.mxu0 }
  0xfb   : > { %v1076_v7 = vpop.f32.mrf.mxu1 }
  0xfc   : > { %v1100_v60 = vadd.f32 %v1099_v57, %v1093_v58  ;;  %v1045_v61 = vadd.f32 %v1044_v49, %v1016_v59 }
  0xfe   : > { %v1074_v62 = vadd.f32 %v1073_v56, %v1045_v61  ;;  %v1018_v1 = vpop.f32.mrf.mxu3 }
  0xff   : > { %v989_v0 = vpop.f32.mrf.mxu2 }
 0x100   : > { %v1086_v2 = vmax.f32 %v1074_v62, 0.0  ;;  %v990_v3 = vadd.f32 %v989_v0, %v2458_v44 }
 0x102   : > { %v1094_v5 = vmul.f32 %v1086_v2, %v2514_v63  ;;  %v1019_v6 = vadd.f32 %v1018_v1, %v990_v3  ;;  %v1049_v16 = vpop.f32.mrf.mxu0 }
 0x103   : > { %v1078_v19 = vpop.f32.mrf.mxu1 }
 0x104   : > { %v1101_v8 = vadd.f32 %v1100_v60, %v1094_v5  ;;  %v1048_v9 = vadd.f32 %v1047_v38, %v1019_v6 }
 0x106   : > { %v1077_v11 = vadd.f32 %v1076_v7, %v1048_v9  ;;  %v1020_v15 = vpop.f32.mrf.mxu3 }
 0x107   : > { %v991_v13 = vpop.f32.mrf.mxu2 }
 0x108   : > { %v1087_v44 = vmax.f32 %v1077_v11, 0.0  ;;  %v992_v14 = vadd.f32 %v991_v13, %v963_v10 }
 0x10a   : > { %v1095_v24 = vmul.f32 %v1087_v44, %v2524_v12  ;;  %v1021_v47 = vadd.f32 %v1020_v15, %v992_v14 }
 0x10c   : > { %v1102_v17 = vadd.f32 %v1101_v8, %v1095_v24  ;;  %v1050_v18 = vadd.f32 %v1049_v16, %v1021_v47 }
 0x10e   : > { %v1079_v20 = vadd.f32 %v1078_v19, %v1050_v18  ;;  %v488_v19 = vld [vmem:[%s2880_s2 + $0x13] sm:$0x1] }
 0x110   : > { %v1088_v21 = vmax.f32 %v1079_v20, 0.0 }
 0x112   : > { %v1096_v22 = vmul.f32 %v1088_v21, %v2530_v48 }
 0x114   : > { %v1103_v23 = vadd.f32 %v1102_v17, %v1096_v22 }
 0x116   : > { %v1104_v25 = vrot.slane %v1103_v23, 4 }
 0x118   : > { %v1105_v26 = vadd.f32 %v1104_v25, %v1103_v23  ;;  %v2170_v25 = vld [vmem:[%s2880_s2 + $0x14] ss:$0 sm:$0xff] }
 0x11a   : > { %v1106_v28 = vrot.slane %v1105_v26, 2 }
 0x11c   : > { %v1107_v29 = vadd.f32 %v1106_v28, %v1105_v26 }
 0x11e   : > { %v1108_v30 = vrot.slane %v1107_v29, 1 }
 0x120   : > { %v1109_v31 = vadd.f32 %v1108_v30, %v1107_v29 }
 0x122   : > { %v1110_v33 = vmul.f32 0.025, %v1109_v31 }
 0x124   : > { %v1111_v37 = vsub.f32 %v2492_v32, %v1110_v33  ;;  %v1112_v39 = vsub.f32 %v2484_v36, %v1110_v33  ;;  %v1113_v42 = vsub.f32 %v2495_v41, %v1110_v33  ;;  %v1114_v43 = vsub.f32 %v2500_v45, %v1110_v33 }
 0x125   : > { %v1115_v46 = vsub.f32 %v1093_v58, %v1110_v33  ;;  %v1116_v49 = vsub.f32 %v1094_v5, %v1110_v33  ;;  %v1117_v51 = vsub.f32 %v1095_v24, %v1110_v33  ;;  %v1118_v41 = vsub.f32 %v1096_v22, %v1110_v33 }
 0x126   : > { %v1119_v52 = vmul.f32 %v1111_v37, %v2476_v34  ;;  %v1120_v53 = vmul.f32 %v1112_v39, %v2470_v27  ;;  %v1121_v54 = vmul.f32 %v1113_v42, %v2481_v35  ;;  %v1122_v55 = vmul.f32 %v1114_v43, %v2489_v40 }
 0x127   : > { %v1123_v32 = vmul.f32 %v1115_v46, %v2505_v50  ;;  %v1124_v45 = vmul.f32 %v1116_v49, %v2514_v63  ;;  %v1125_v61 = vmul.f32 %v1117_v51, %v2524_v12  ;;  %v1126_v1 = vmul.f32 %v1118_v41, %v2530_v48 }
 0x128   : > { %v1127_v56 = vmul.f32 %v1119_v52, %v1119_v52  ;;  %v1128_v57 = vmul.f32 %v1120_v53, %v1120_v53  ;;  %v1129_v36 = vmul.f32 %v1121_v54, %v1121_v54  ;;  %v1130_v58 = vmul.f32 %v1122_v55, %v1122_v55 }
 0x129   : > { %v1131_v62 = vmul.f32 %v1123_v32, %v1123_v32  ;;  %v1132_v2 = vmul.f32 %v1124_v45, %v1124_v45  ;;  %v1133_v38 = vmul.f32 %v1125_v61, %v1125_v61  ;;  %v1134_v5 = vmul.f32 %v1126_v1, %v1126_v1 }
 0x12a   : > { %v1135_v59 = vadd.f32 %v1128_v57, %v1127_v56 }
 0x12c   : > { %v1136_v60 = vadd.f32 %v1135_v59, %v1129_v36 }
 0x12e   : > { %v1137_v0 = vadd.f32 %v1136_v60, %v1130_v58  ;;  %v2579_v58 = vld [vmem:[%s2880_s2 + $0x8] ss:$0 sm:$0xff] }
 0x130   : > { %v1138_v3 = vadd.f32 %v1137_v0, %v1131_v62 }
 0x132   : > { %v1139_v4 = vadd.f32 %v1138_v3, %v1132_v2 }
 0x134   : > { %v1140_v6 = vadd.f32 %v1139_v4, %v1133_v38 }
 0x136   : > { %v1141_v7 = vadd.f32 %v1140_v6, %v1134_v5 }
 0x138   : > { %v1142_v8 = vrot.slane %v1141_v7, 4 }
 0x13a   : > { %v1143_v9 = vadd.f32 %v1142_v8, %v1141_v7 }
 0x13c   : > { %v1144_v10 = vrot.slane %v1143_v9, 2 }
 0x13e   : > { %v1145_v11 = vadd.f32 %v1144_v10, %v1143_v9 }
 0x140   : > { %v1146_v13 = vrot.slane %v1145_v11, 1 }
 0x142   : > { %v1147_v44 = vadd.f32 %v1146_v13, %v1145_v11 }
 0x144   : > { %v1148_v14 = vmul.f32 0.025, %v1147_v44 }
 0x146   : > { %v1149_v15 = vadd.f32 1e-05, %v1148_v14 }
 0x148   : > { %2193 = vrsqrt.f32 %v1149_v15  ;;  %vm1156_vm1 = vweird.f32 %v1149_v15 }
 0x14e   : > { %v2194_v24 = vpop.eup %2193 }
 0x14f   : > { %v1151_v47 = vmul.f32 %v2194_v24, %v1149_v15  ;;  %vm1157_vm0 = vweird.f32 %v2194_v24 }
 0x150   : > { %vm1158_vm2 = vmor %vm1156_vm1, %vm1157_vm0 }
 0x151   : > { %v1152_v16 = vmul.f32 %v2194_v24, %v1151_v47 }
 0x153   : > { %v1153_v17 = vmul.f32 0.5, %v1152_v16 }
 0x155   : > { %v1154_v18 = vsub.f32 1.5, %v1153_v17 }
 0x157   : > { %v1155_v20 = vmul.f32 %v2194_v24, %v1154_v18 }
 0x159   : > { %v1159_v21 = vsel %vm1158_vm2, %v2194_v24, %v1155_v20 }
 0x15a   : > { %v1160_v22 = vmul.f32 %v1159_v21, %v488_v19 }
 0x15c   : > { %v1161_v23 = vperm.slane %v1160_v22, 0 }
 0x15e   : > { %v1162_v26 = vmul.f32 %v1161_v23, %v1119_v52  ;;  %v1163_v28 = vmul.f32 %v1161_v23, %v1120_v53  ;;  %v1164_v29 = vmul.f32 %v1161_v23, %v1121_v54  ;;  %v1165_v30 = vmul.f32 %v1161_v23, %v1122_v55 }
 0x15f   : > { %v1166_v31 = vmul.f32 %v1161_v23, %v1123_v32  ;;  %v1167_v33 = vmul.f32 %v1161_v23, %v1124_v45  ;;  %v1168_v37 = vmul.f32 %v1161_v23, %v1125_v61  ;;  %v1169_v39 = vmul.f32 %v1161_v23, %v1126_v1 }
 0x160   : > { %v1171_v42 = vadd.f32 %v2170_v25, %v1162_v26  ;;  %v1172_v43 = vadd.f32 %v2170_v25, %v1163_v28  ;;  %v1173_v46 = vadd.f32 %v2170_v25, %v1164_v29  ;;  %v1174_v49 = vadd.f32 %v2170_v25, %v1165_v30  ;;  %v2175_v28 = vld [vmem:[%s2880_s2 + $0x4] ss:$0 sm:$0xff] }
 0x161   : > { %v1175_v51 = vadd.f32 %v2170_v25, %v1166_v31  ;;  %v1176_v56 = vadd.f32 %v2170_v25, %v1167_v33  ;;  %v1177_v57 = vadd.f32 %v2170_v25, %v1168_v37  ;;  %v1178_v53 = vadd.f32 %v2170_v25, %v1169_v39 }
 0x162   : > { %v1179_v36 = vmul.f32 %v1171_v42, %v2476_v34  ;;  %v1180_v59 = vmul.f32 %v1172_v43, %v2470_v27  ;;  %v1181_v52 = vmul.f32 %v1173_v46, %v2481_v35  ;;  %v1182_v54 = vmul.f32 %v1174_v49, %v2489_v40  ;;  %v2171_v34 = vld [vmem:[%s2880_s2] ss:$0 sm:$0xff]  ;;  %v2176_v35 = vld [vmem:[%s2880_s2 + $0x5] ss:$0 sm:$0xff]  ;;  %v2172_v40 = vld [vmem:[%s2880_s2 + $0x1] ss:$0 sm:$0xff] }
 0x163   : > { %v1183_v55 = vmul.f32 %v1175_v51, %v2505_v50  ;;  %v1184_v32 = vmul.f32 %v1176_v56, %v2514_v63  ;;  %v1185_v41 = vmul.f32 %v1177_v57, %v2524_v12  ;;  %v1186_v27 = vmul.f32 %v1178_v53, %v2530_v48  ;;  %v2173_v50 = vld [vmem:[%s2880_s2 + $0x2] ss:$0 sm:$0xff]  ;;  %v2574_v63 = vld [vmem:[%s2880_s2 + $0x3] ss:$0 sm:$0xff] }
 0x164   : > { %1187 = vst [vmem:[#allocation3] sm:$0xff] %v1179_v36  ;;  %v1203_v12 = vmul.f32 %v2171_v34, %v1179_v36  ;;  %v1204_v48 = vmul.f32 %v2171_v34, %v1180_v59  ;;  %v1205_v45 = vmul.f32 %v2171_v34, %v1181_v52  ;;  %v1206_v60 = vmul.f32 %v2171_v34, %v1182_v54 }
 0x165   : > { %1188 = vst [vmem:[#allocation3 + $0x8] sm:$0xff] %v1180_v59  ;;  %v1207_v61 = vmul.f32 %v2171_v34, %v1183_v55  ;;  %v1208_v62 = vmul.f32 %v2171_v34, %v1184_v32  ;;  %v2581_v0 = vmul.f32 %v2176_v35, %v1180_v59  ;;  %v2583_v38 = vmul.f32 %v2176_v35, %v1181_v52 }
 0x166   : > { %1189 = vst [vmem:[#allocation3 + $0x10] sm:$0xff] %v1181_v52  ;;  %v2585_v4 = vmul.f32 %v2176_v35, %v1182_v54  ;;  %v2587_v5 = vmul.f32 %v2176_v35, %v1183_v55  ;;  %v2589_v6 = vmul.f32 %v2176_v35, %v1184_v32  ;;  %v2592_v44 = vmul.f32 %v2176_v35, %v1185_v41 }
 0x167   : > { %1190 = vst [vmem:[#allocation3 + $0x18] sm:$0xff] %v1182_v54 }
 0x168   : > { %1191 = vst [vmem:[#allocation3 + $0x20] sm:$0xff] %v1183_v55 }
 0x169   : > { %1192 = vst [vmem:[#allocation3 + $0x28] sm:$0xff] %v1184_v32 }
 0x16a   : > { %1193 = vst [vmem:[#allocation3 + $0x30] sm:$0xff] %v1185_v41 }
 0x16b   : > { %1194 = vst [vmem:[#allocation3 + $0x38] sm:$0xff] %v1186_v27 }
 0x16c   : > { %v1209_v1 = vld [vmem:[#allocation3 + $0x1] sm:$0xff] }
 0x16d   : > { %v1229_v2 = vld [vmem:[#allocation3 + $0x2] sm:$0xff]  ;;  %v1217_v8 = vmul.f32 %v2172_v40, %v1209_v1  ;;  %v1230_v9 = vld [vmem:[#allocation3 + $0xa] sm:$0xff] }
 0x16e   : > { %v1249_v3 = vld [vmem:[#allocation3 + $0x6] sm:$0xff]  ;;  %v1237_v10 = vmul.f32 %v2173_v50, %v1229_v2  ;;  %v1250_v11 = vld [vmem:[#allocation3 + $0xe] sm:$0xff]  ;;  %v1238_v47 = vmul.f32 %v2173_v50, %v1230_v9  ;;  %v2594_v16 = vld [vmem:[#allocation3 + $0x16] sm:$0xff] }
 0x16f   : > { %v1210_v7 = vld [vmem:[#allocation3 + $0x9] sm:$0xff]  ;;  %v1257_v13 = vmul.f32 %v2574_v63, %v1249_v3  ;;  %v1211_v14 = vld [vmem:[#allocation3 + $0x11] sm:$0xff]  ;;  %v1258_v17 = vmul.f32 %v2574_v63, %v1250_v11  ;;  %v2598_v18 = vmul.f32 %v2579_v58, %v1250_v11  ;;  %v1212_v19 = vld [vmem:[#allocation3 + $0x19] sm:$0xff]  ;;  %v1223_v21 = vadd.f32 %v1217_v8, %v1203_v12 }
 0x170   : > { %v1218_v15 = vmul.f32 %v2172_v40, %v1210_v7  ;;  %v1231_v24 = vld [vmem:[#allocation3 + $0x12] sm:$0xff]  ;;  %v1219_v20 = vmul.f32 %v2172_v40, %v1211_v14  ;;  %v1232_v22 = vld [vmem:[#allocation3 + $0x1a] sm:$0xff]  ;;  %v1259_v26 = vmul.f32 %v2574_v63, %v2594_v16  ;;  %v1220_v30 = vmul.f32 %v2172_v40, %v1212_v19  ;;  %v1233_v33 = vld [vmem:[#allocation3 + $0x22] sm:$0xff] }
 0x171   : > { %v1239_v23 = vmul.f32 %v2173_v50, %v1231_v24  ;;  %v2600_v25 = vld [vmem:[#allocation3 + $0x1e] sm:$0xff]  ;;  %v1240_v37 = vmul.f32 %v2173_v50, %v1232_v22  ;;  %v2607_v39 = vld [vmem:[#allocation3 + $0x26] sm:$0xff]  ;;  %v1241_v56 = vmul.f32 %v2173_v50, %v1233_v33  ;;  %v1243_v57 = vadd.f32 %v1237_v10, %v1223_v21  ;;  %v2611_v36 = vld [vmem:[#allocation3 + $0x2e] sm:$0xff] }
 0x172   : > { %v1213_v29 = vld [vmem:[#allocation3 + $0x21] sm:$0xff]  ;;  %v1224_v31 = vadd.f32 %v1218_v15, %v1204_v48  ;;  %v1260_v42 = vmul.f32 %v2574_v63, %v2600_v25  ;;  %v1214_v43 = vld [vmem:[#allocation3 + $0x29] sm:$0xff]  ;;  %v1225_v49 = vadd.f32 %v1219_v20, %v1205_v45  ;;  %v1226_v52 = vadd.f32 %v1220_v30, %v1206_v60  ;;  %v1271_v12 = vld [vmem:[#allocation3 + $0x17] sm:$0xff] }
 0x173   : > { %v1221_v46 = vmul.f32 %v2172_v40, %v1213_v29  ;;  %v1234_v51 = vld [vmem:[#allocation3 + $0x2a] sm:$0xff]  ;;  %v1222_v59 = vmul.f32 %v2172_v40, %v1214_v43  ;;  %v1261_v27 = vmul.f32 %v2574_v63, %v2607_v39  ;;  %v1262_v35 = vmul.f32 %v2574_v63, %v2611_v36  ;;  %v1272_v48 = vld [vmem:[#allocation3 + $0x1f] sm:$0xff]  ;;  %v1305_v24 = vld [vmem:[#allocation3 + $0x14] sm:$0xff] }
 0x174   : > { %v1242_v53 = vmul.f32 %v2173_v50, %v1234_v51  ;;  %v1244_v54 = vadd.f32 %v1238_v47, %v1224_v31  ;;  %v1269_v55 = vld [vmem:[#allocation3 + $0x7] sm:$0xff]  ;;  %v1270_v32 = vld [vmem:[#allocation3 + $0xf] sm:$0xff]  ;;  %v1245_v34 = vadd.f32 %v1239_v23, %v1225_v49  ;;  %v1246_v1 = vadd.f32 %v1240_v37, %v1226_v52  ;;  %v1306_v23 = vld [vmem:[#allocation3 + $0x1c] sm:$0xff] }
 0x175   : > { %v1227_v41 = vadd.f32 %v1221_v46, %v1207_v61  ;;  %v1228_v45 = vadd.f32 %v1222_v59, %v1208_v62  ;;  %v1263_v2 = vadd.f32 %v1257_v13, %v1243_v57  ;;  %v1273_v40 = vld [vmem:[#allocation3 + $0x27] sm:$0xff]  ;;  %v1274_v60 = vld [vmem:[#allocation3 + $0x2f] sm:$0xff]  ;;  %v1277_v8 = vmul.f32 %v2175_v28, %v1269_v55  ;;  %v2177_v61 = vld [vmem:[%s2880_s2 + $0x6] ss:$0 sm:$0xff] }
 0x176   : > { %v1264_v3 = vadd.f32 %v1258_v17, %v1244_v54  ;;  %v1265_v7 = vadd.f32 %v1259_v26, %v1245_v34  ;;  %v1278_v9 = vmul.f32 %v2175_v28, %v1270_v32  ;;  %v1266_v11 = vadd.f32 %v1260_v42, %v1246_v1  ;;  %v1304_v15 = vld [vmem:[#allocation3 + $0xc] sm:$0xff]  ;;  %v1307_v26 = vld [vmem:[#allocation3 + $0x24] sm:$0xff]  ;;  %v1309_v33 = vld [vmem:[#allocation3 + $0x34] sm:$0xff] }
 0x177   : > { %v1247_v50 = vadd.f32 %v1241_v56, %v1227_v41  ;;  %v1248_v10 = vadd.f32 %v1242_v53, %v1228_v45  ;;  %v1279_v14 = vmul.f32 %v2175_v28, %v1271_v12  ;;  %v1280_v63 = vmul.f32 %v2175_v28, %v1272_v48  ;;  %v1308_v29 = vld [vmem:[#allocation3 + $0x2c] sm:$0xff]  ;;  %v2178_v43 = vld [vmem:[%s2880_s2 + $0x7] ss:$0 sm:$0xff]  ;;  %v1325_v53 = vld [vmem:[#allocation3 + $0x15] sm:$0xff] }
 0x178   : > { %v1281_v47 = vmul.f32 %v2175_v28, %v1273_v40  ;;  %v1282_v13 = vmul.f32 %v2175_v28, %v1274_v60  ;;  %v1283_v17 = vadd.f32 %v1277_v8, %v1263_v2  ;;  %v1284_v20 = vadd.f32 %v1278_v9, %v1264_v3  ;;  %v1324_v56 = vld [vmem:[#allocation3 + $0xd] sm:$0xff]  ;;  %v1326_v54 = vld [vmem:[#allocation3 + $0x1d] sm:$0xff]  ;;  %v1327_v55 = vld [vmem:[#allocation3 + $0x25] sm:$0xff] }
 0x179   : > { %v1267_v62 = vadd.f32 %v1261_v27, %v1247_v50  ;;  %v1268_v19 = vadd.f32 %v1262_v35, %v1248_v10  ;;  %v1285_v21 = vadd.f32 %v1279_v14, %v1265_v7  ;;  %v1286_v22 = vadd.f32 %v1280_v63, %v1266_v11  ;;  %v1328_v35 = vld [vmem:[#allocation3 + $0x2d] sm:$0xff]  ;;  %v1344_v50 = vld [vmem:[#allocation3 + $0x36] sm:$0xff]  ;;  %v2180_v10 = vld [vmem:[%s2880_s2 + $0x15] ss:$0 sm:$0xff] }
 0x17a   : > { %v1298_v31 = vadd.f32 %v2581_v0, %v1283_v17  ;;  %v1312_v37 = vmul.f32 %v2177_v61, %v1304_v15  ;;  %v1313_v42 = vmul.f32 %v2177_v61, %v1305_v24  ;;  %v1299_v28 = vadd.f32 %v2583_v38, %v1284_v20  ;;  %v1329_v38 = vld [vmem:[#allocation3 + $0x35] sm:$0xff] }
 0x17b   : > { %v1287_v30 = vadd.f32 %v1281_v47, %v1267_v62  ;;  %v1288_v46 = vadd.f32 %v1282_v13, %v1268_v19  ;;  %v1300_v49 = vadd.f32 %v2585_v4, %v1285_v21  ;;  %v1301_v51 = vadd.f32 %v2587_v5, %v1286_v22  ;;  %v2645_v22 = vld [vmem:[%s2879_s1 + $0x40] sm:$0xff] }
 0x17c   : > { %v1314_v59 = vmul.f32 %v2177_v61, %v1306_v23  ;;  %v1315_v52 = vmul.f32 %v2177_v61, %v1307_v26  ;;  %v1316_v0 = vmul.f32 %v2177_v61, %v1308_v29  ;;  %v1317_v41 = vmul.f32 %v2177_v61, %v1309_v33  ;;  %v2655_v29 = vld [vmem:[%s2879_s1 + $0x50] sm:$0xff] }
 0x17d   : > { %v1302_v57 = vadd.f32 %v2589_v6, %v1287_v30  ;;  %v1303_v32 = vadd.f32 %v2592_v44, %v1288_v46  ;;  %v1318_v34 = vadd.f32 %v1312_v37, %v1298_v31  ;;  %v1319_v27 = vadd.f32 %v1313_v42, %v1299_v28  ;;  %v2662_v42 = vld [vmem:[%s2879_s1 + $0x58] sm:$0xff] }
 0x17e   : > { %v1320_v12 = vadd.f32 %v1314_v59, %v1300_v49  ;;  %v1321_v4 = vadd.f32 %v1315_v52, %v1301_v51  ;;  %v1332_v5 = vmul.f32 %v2178_v43, %v1324_v56  ;;  %v1333_v1 = vmul.f32 %v2178_v43, %v1325_v53  ;;  %v2668_v49 = vld [vmem:[%s2879_s1 + $0x60] sm:$0xff]  ;;  %v2674_v59 = vld [vmem:[%s2879_s1 + $0x68] sm:$0xff] }
 0x17f   : > { %v1322_v48 = vadd.f32 %v1316_v0, %v1302_v57  ;;  %v1323_v45 = vadd.f32 %v1317_v41, %v1303_v32  ;;  %v1334_v6 = vmul.f32 %v2178_v43, %v1326_v54  ;;  %v1335_v2 = vmul.f32 %v2178_v43, %v1327_v55 }
 0x180   : > { %v1336_v3 = vmul.f32 %v2178_v43, %v1328_v35  ;;  %v1337_v40 = vmul.f32 %v2178_v43, %v1329_v38  ;;  %v1338_v60 = vadd.f32 %v1332_v5, %v1318_v34  ;;  %v1348_v44 = vmul.f32 %v2579_v58, %v2594_v16 }
 0x181   : > { %v1339_v7 = vadd.f32 %v1333_v1, %v1319_v27  ;;  %v1340_v8 = vadd.f32 %v1334_v6, %v1320_v12  ;;  %v1341_v9 = vadd.f32 %v1335_v2, %v1321_v4  ;;  %v1349_v61 = vmul.f32 %v2579_v58, %v2600_v25 }
 0x182   : > { %v1342_v11 = vadd.f32 %v1336_v3, %v1322_v48  ;;  %v1343_v14 = vadd.f32 %v1337_v40, %v1323_v45  ;;  %v1350_v63 = vmul.f32 %v2579_v58, %v2607_v39  ;;  %v1351_v15 = vmul.f32 %v2579_v58, %v2611_v36  ;;  %v2650_v39 = vld [vmem:[%s2879_s1 + $0x48] sm:$0xff] }
 0x183   : > { %v1352_v16 = vmul.f32 %v2579_v58, %v1344_v50  ;;  %v1353_v24 = vadd.f32 %v2598_v18, %v1338_v60  ;;  %v1354_v62 = vadd.f32 %v1348_v44, %v1339_v7  ;;  %v1355_v47 = vadd.f32 %v1349_v61, %v1340_v8 }
 0x184   : > { %v1356_v13 = vadd.f32 %v1350_v63, %v1341_v9  ;;  %v1357_v25 = vadd.f32 %v1351_v15, %v1342_v11 }
 0x185   : > { %v1358_v17 = vadd.f32 %v1352_v16, %v1343_v14  ;;  %v1370_v19 = vadd.f32 %v2180_v10, %v1353_v24  ;;  %v1371_v20 = vadd.f32 %v2180_v10, %v1354_v62  ;;  %v1372_v21 = vadd.f32 %v2180_v10, %v1355_v47 }
 0x186   : > { %v1373_v58 = vadd.f32 %v2180_v10, %v1356_v13  ;;  %v1374_v18 = vadd.f32 %v2180_v10, %v1357_v25 }
 0x187   : > { %v1376_v36 = vmax.f32 %v1370_v19, 0.0  ;;  %v1377_v23 = vmax.f32 %v1371_v20, 0.0  ;;  %v1378_v26 = vmax.f32 %v1372_v21, 0.0  ;;  %v1375_v30 = vadd.f32 %v2180_v10, %v1358_v17  ;;  %v1688_v21 = vld [vmem:[%s2882_s4 + $0x78] sm:$0xff] }
 0x188   : > { %v1379_v31 = vmax.f32 %v1373_v58, 0.0  ;;  %v1380_v43 = vmax.f32 %v1374_v18, 0.0  ;;  %v1687_v58 = vld [vmem:[%s2882_s4 + $0x70] sm:$0xff]  ;;  %1690 = vmatpush.msra.mxu2 %v1688_v21 }
 0x189   : > { %v1382_v33 = vmul.f32 %v2645_v22, %v1376_v36  ;;  %v1383_v37 = vmul.f32 %v2650_v39, %v1377_v23  ;;  %v1384_v46 = vmul.f32 %v2655_v29, %v1378_v26  ;;  %v1381_v51 = vmax.f32 %v1375_v30, 0.0  ;;  %v1686_v36 = vld [vmem:[%s2882_s4 + $0x68] sm:$0xff]  ;;  %v1685_v23 = vld [vmem:[%s2882_s4 + $0x60] sm:$0xff]  ;;  %v1684_v26 = vld [vmem:[%s2882_s4 + $0x58] sm:$0xff] }
 0x18a   : > { %v1385_v56 = vmul.f32 %v2662_v42, %v1379_v31  ;;  %v1386_v52 = vmul.f32 %v2668_v49, %v1380_v43  ;;  %1691 = vmatpush.msra.mxu2 %v1687_v58  ;;  %v1683_v30 = vld [vmem:[%s2882_s4 + $0x50] sm:$0xff] }
 0x18b   : > { %v1388_v28 = vadd.f32 %v1383_v37, %v1382_v33  ;;  %v1387_v53 = vmul.f32 %v2674_v59, %v1381_v51  ;;  %v1680_v51 = vld [vmem:[%s2882_s4 + $0x38] sm:$0xff] }
 0x18c   : > { %1692 = vmatpush.msra.mxu2 %v1686_v36 }
 0x18d   : > { %v1389_v57 = vadd.f32 %v1388_v28, %v1384_v46 }
 0x18e   : > { %1693 = vmatpush.msra.mxu2 %v1685_v23 }
 0x18f   : > { %v1390_v0 = vadd.f32 %v1389_v57, %v1385_v56  ;;  %v1679_v57 = vld [vmem:[%s2882_s4 + $0x30] sm:$0xff] }
 0x190   : > { %1694 = vmatpush.msra.mxu2 %v1684_v26 }
 0x191   : > { %v1391_v54 = vadd.f32 %v1390_v0, %v1386_v52 }
 0x192   : > { %1695 = vmatpush.msra.mxu2 %v1683_v30 }
 0x193   : > { %v1392_v55 = vadd.f32 %v1391_v54, %v1387_v53 }
 0x195   : > { %v1393_v32 = vrot.slane %v1392_v55, 4 }
 0x197   : > { %v1394_v41 = vadd.f32 %v1393_v32, %v1392_v55  ;;  %v1677_v55 = vld [vmem:[%s2882_s4 + $0x20] sm:$0xff] }
 0x199   : > { %v1395_v34 = vrot.slane %v1394_v41, 2 }
 0x19b   : > { %v1396_v27 = vadd.f32 %v1395_v34, %v1394_v41  ;;  %v1676_v41 = vld [vmem:[%s2882_s4 + $0x18] sm:$0xff] }
 0x19d   : > { %v1397_v35 = vrot.slane %v1396_v27, 1 }
 0x19f   : > { %v1398_v38 = vadd.f32 %v1397_v35, %v1396_v27  ;;  %v2181_v27 = vld [vmem:[%s2880_s2 + $0x17] ss:$0 sm:$0xff] }
 0x1a0   : > { %v1675_v35 = vld [vmem:[%s2882_s4 + $0x10] sm:$0xff] }
 0x1a1   : > { %v1399_v12 = vmul.f32 0.055555556, %v1398_v38 }
 0x1a3   : > { %v1400_v4 = vsub.f32 %v1382_v33, %v1399_v12  ;;  %v1401_v48 = vsub.f32 %v1383_v37, %v1399_v12  ;;  %v1402_v5 = vsub.f32 %v1384_v46, %v1399_v12  ;;  %v1403_v45 = vsub.f32 %v1385_v56, %v1399_v12  ;;  %v1682_v37 = vld [vmem:[%s2882_s4 + $0x48] sm:$0xff]  ;;  %v1681_v46 = vld [vmem:[%s2882_s4 + $0x40] sm:$0xff] }
 0x1a4   : > { %v1404_v1 = vsub.f32 %v1386_v52, %v1399_v12  ;;  %v1405_v6 = vsub.f32 %v1387_v53, %v1399_v12  ;;  %1696 = vmatpush.msra.mxu2 %v1682_v37  ;;  %v1360_v52 = vld [vmem:[%s2880_s2 + $0x16] sm:$0x1]  ;;  %v1678_v53 = vld [vmem:[%s2882_s4 + $0x28] sm:$0xff] }
 0x1a5   : > { %v2679_v2 = vmul.f32 %v2645_v22, %v1400_v4  ;;  %v2682_v3 = vmul.f32 %v2650_v39, %v1401_v48  ;;  %v2685_v40 = vmul.f32 %v2655_v29, %v1402_v5  ;;  %v2688_v60 = vmul.f32 %v2662_v42, %v1403_v45  ;;  %v1674_v45 = vld [vmem:[%s2882_s4 + $0x8] sm:$0xff] }
 0x1a6   : > { %v2695_v7 = vmul.f32 %v2668_v49, %v1404_v1  ;;  %v1411_v61 = vmul.f32 %v2674_v59, %v1405_v6  ;;  %1697 = vmatpush.msra.mxu2 %v1681_v46 }
 0x1a7   : > { %v1412_v50 = vmul.f32 %v2679_v2, %v2679_v2  ;;  %v1413_v44 = vmul.f32 %v2682_v3, %v2682_v3  ;;  %v1414_v8 = vmul.f32 %v2685_v40, %v2685_v40  ;;  %v1415_v10 = vmul.f32 %v2688_v60, %v2688_v60 }
 0x1a8   : > { %v1416_v14 = vmul.f32 %v2695_v7, %v2695_v7  ;;  %v1417_v15 = vmul.f32 %v1411_v61, %v1411_v61  ;;  %1698 = vmatpush.msra.mxu2 %v1680_v51 }
 0x1a9   : > { %v1418_v9 = vadd.f32 %v1413_v44, %v1412_v50 }
 0x1aa   : > { %1699 = vmatpush.msra.mxu2 %v1679_v57 }
 0x1ab   : > { %v1419_v11 = vadd.f32 %v1418_v9, %v1414_v8 }
 0x1ac   : > { %1700 = vmatpush.msra.mxu2 %v1678_v53 }
 0x1ad   : > { %v1420_v63 = vadd.f32 %v1419_v11, %v1415_v10 }
 0x1ae   : > { %1701 = vmatpush.msra.mxu2 %v1677_v55 }
 0x1af   : > { %v1421_v16 = vadd.f32 %v1420_v63, %v1416_v14 }
 0x1b0   : > { %1702 = vmatpush.msra.mxu2 %v1676_v41 }
 0x1b1   : > { %v1422_v24 = vadd.f32 %v1421_v16, %v1417_v15 }
 0x1b2   : > { %1703 = vmatpush.msra.mxu2 %v1675_v35 }
 0x1b3   : > { %v1423_v62 = vrot.slane %v1422_v24, 4 }
 0x1b4   : > { %1704 = vmatpush.msra.mxu2 %v1674_v45 }
 0x1b5   : > { %v1424_v47 = vadd.f32 %v1423_v62, %v1422_v24  ;;  %v2186_v24 = vld [vmem:[%s2880_s2 + $0xd] ss:$0 sm:$0xff] }
 0x1b7   : > { %v1425_v13 = vrot.slane %v1424_v47, 2 }
 0x1b9   : > { %v1426_v25 = vadd.f32 %v1425_v13, %v1424_v47 }
 0x1bb   : > { %v1427_v17 = vrot.slane %v1426_v25, 1 }
 0x1bd   : > { %v1428_v19 = vadd.f32 %v1427_v17, %v1426_v25 }
 0x1bf   : > { %v1429_v20 = vmul.f32 0.055555556, %v1428_v19 }
 0x1c1   : > { %v1430_v18 = vadd.f32 1e-05, %v1429_v20 }
 0x1c3   : > { %2195 = vrsqrt.f32 %v1430_v18  ;;  %vm1437_vm4 = vweird.f32 %v1430_v18 }
 0x1c9   : > { %v2196_v31 = vpop.eup %2195 }
 0x1ca   : > { %v1432_v33 = vmul.f32 %v2196_v31, %v1430_v18  ;;  %vm1438_vm3 = vweird.f32 %v2196_v31 }
 0x1cb   : > { %vm1439_vm5 = vmor %vm1437_vm4, %vm1438_vm3 }
 0x1cc   : > { %v1433_v43 = vmul.f32 %v2196_v31, %v1432_v33 }
 0x1ce   : > { %v1434_v28 = vmul.f32 0.5, %v1433_v43 }
 0x1d0   : > { %v1435_v56 = vsub.f32 1.5, %v1434_v28 }
 0x1d2   : > { %v1436_v0 = vmul.f32 %v2196_v31, %v1435_v56 }
 0x1d4   : > { %v1440_v54 = vsel %vm1439_vm5, %v2196_v31, %v1436_v0  ;;  %v2187_v0 = vld [vmem:[%s2880_s2 + $0xe] ss:$0 sm:$0xff] }
 0x1d5   : > { %v1441_v32 = vmul.f32 %v1440_v54, %v1360_v52 }
 0x1d7   : > { %v1442_v34 = vperm.slane %v1441_v32, 0 }
 0x1d9   : > { %v1443_v38 = vmul.f32 %v1442_v34, %v2679_v2  ;;  %v1445_v12 = vmul.f32 %v1442_v34, %v2685_v40  ;;  %v1446_v4 = vmul.f32 %v1442_v34, %v2688_v60  ;;  %v1447_v48 = vmul.f32 %v1442_v34, %v2695_v7  ;;  %v1673_v2 = vld [vmem:[%s2882_s4] sm:$0xff] }
 0x1da   : > { %v1448_v5 = vmul.f32 %v1442_v34, %v1411_v61  ;;  %v1444_v1 = vmul.f32 %v1442_v34, %v2682_v3  ;;  %1705 = vmatpush.msra.mxu2 %v1673_v2 }
 0x1db   : > { %v1450_v6 = vadd.f32 %v2181_v27, %v1443_v38  ;;  %v1452_v50 = vadd.f32 %v2181_v27, %v1445_v12  ;;  %v1453_v44 = vadd.f32 %v2181_v27, %v1446_v4  ;;  %v1454_v60 = vadd.f32 %v2181_v27, %v1447_v48  ;;  %v2188_v4 = vld [vmem:[%s2880_s2 + $0xf] ss:$0 sm:$0xff] }
 0x1dc   : > { %v1455_v8 = vadd.f32 %v2181_v27, %v1448_v5  ;;  %v1451_v40 = vadd.f32 %v2181_v27, %v1444_v1 }
 0x1dd   : > { %v1456_v7 = vmul.f32 %v2645_v22, %v1450_v6  ;;  %v2769_v3 = vmul.f32 %v2655_v29, %v1452_v50  ;;  %v2772_v10 = vmul.f32 %v2662_v42, %v1453_v44  ;;  %v2775_v11 = vmul.f32 %v2668_v49, %v1454_v60  ;;  %v2182_v22 = vld [vmem:[%s2880_s2 + $0x9] ss:$0 sm:$0xff]  ;;  %v2184_v29 = vld [vmem:[%s2880_s2 + $0xb] ss:$0 sm:$0xff]  ;;  %v2189_v60 = vld [vmem:[%s2880_s2 + $0x10] ss:$0 sm:$0xff] }
 0x1de   : > { %v1461_v9 = vmul.f32 %v2674_v59, %v1455_v8  ;;  %v2766_v61 = vmul.f32 %v2650_v39, %v1451_v40  ;;  %v2183_v39 = vld [vmem:[%s2880_s2 + $0xa] ss:$0 sm:$0xff]  ;;  %v2185_v59 = vld [vmem:[%s2880_s2 + $0xc] ss:$0 sm:$0xff] }
 0x1df   : > { %1462 = vst [vmem:[#allocation4] sm:$0xff] %v1456_v7  ;;  %v1474_v14 = vmul.f32 %v2182_v22, %v1456_v7  ;;  %v1476_v19 = vmul.f32 %v2182_v22, %v2769_v3  ;;  %v1477_v26 = vmul.f32 %v2182_v22, %v2772_v10 }
 0x1e0   : > { %1467 = vst [vmem:[#allocation4 + $0x28] sm:$0xff] %v1461_v9  ;;  %v1475_v62 = vmul.f32 %v2182_v22, %v2766_v61  ;;  %v1537_v2 = vmul.f32 %v2187_v0, %v2766_v61 }
 0x1e1   : > { %1463 = vst [vmem:[#allocation4 + $0x8] sm:$0xff] %v2766_v61  ;;  %v2190_v61 = vld [vmem:[%s2880_s2 + $0x11] ss:$0 sm:$0xff] }
 0x1e2   : > { %1464 = vst [vmem:[#allocation4 + $0x10] sm:$0xff] %v2769_v3 }
 0x1e3   : > { %1465 = vst [vmem:[#allocation4 + $0x18] sm:$0xff] %v2772_v10 }
 0x1e4   : > { %1466 = vst [vmem:[#allocation4 + $0x20] sm:$0xff] %v2775_v11 }
 0x1e8   : > { %v1478_v42 = vld [vmem:[#allocation4 + $0x1] sm:$0xff] }
 0x1e9   : > { %v1492_v49 = vld [vmem:[#allocation4 + $0x2] sm:$0xff]  ;;  %v1484_v15 = vmul.f32 %v2183_v39, %v1478_v42  ;;  %v1493_v16 = vld [vmem:[#allocation4 + $0xa] sm:$0xff] }
 0x1ea   : > { %v1479_v63 = vld [vmem:[#allocation4 + $0x9] sm:$0xff]  ;;  %v1480_v47 = vld [vmem:[#allocation4 + $0x11] sm:$0xff]  ;;  %v1498_v36 = vmul.f32 %v2184_v29, %v1492_v49  ;;  %v1499_v33 = vmul.f32 %v2184_v29, %v1493_v16 }
 0x1eb   : > { %v1485_v13 = vmul.f32 %v2183_v39, %v1479_v63  ;;  %v1494_v25 = vld [vmem:[#allocation4 + $0x12] sm:$0xff]  ;;  %v1506_v17 = vld [vmem:[#allocation4 + $0x6] sm:$0xff]  ;;  %v1486_v21 = vmul.f32 %v2183_v39, %v1480_v47  ;;  %v1488_v58 = vadd.f32 %v1484_v15, %v1474_v14  ;;  %v1495_v18 = vld [vmem:[#allocation4 + $0x1a] sm:$0xff]  ;;  %v1540_v47 = vmul.f32 %v2187_v0, %v2775_v11 }
 0x1ec   : > { %v1481_v20 = vld [vmem:[#allocation4 + $0x19] sm:$0xff]  ;;  %v2798_v23 = vld [vmem:[#allocation4 + $0xe] sm:$0xff]  ;;  %v1500_v28 = vmul.f32 %v2184_v29, %v1494_v25  ;;  %v1512_v57 = vmul.f32 %v2185_v59, %v1506_v17  ;;  %v1501_v54 = vmul.f32 %v2184_v29, %v1495_v18  ;;  %v1548_v63 = vld [vmem:[#allocation4 + $0x24] sm:$0xff] }
 0x1ed   : > { %v1487_v30 = vmul.f32 %v2183_v39, %v1481_v20  ;;  %v1489_v31 = vadd.f32 %v1485_v13, %v1475_v62  ;;  %v2801_v37 = vld [vmem:[#allocation4 + $0x16] sm:$0xff]  ;;  %v1520_v43 = vld [vmem:[#allocation4 + $0x7] sm:$0xff]  ;;  %v1490_v46 = vadd.f32 %v1486_v21, %v1476_v19  ;;  %v1502_v51 = vadd.f32 %v1498_v36, %v1488_v58  ;;  %v2803_v56 = vld [vmem:[#allocation4 + $0x1e] sm:$0xff] }
 0x1ee   : > { %v1521_v52 = vld [vmem:[#allocation4 + $0xf] sm:$0xff]  ;;  %v1513_v32 = vmul.f32 %v2185_v59, %v2798_v23  ;;  %v1522_v41 = vld [vmem:[#allocation4 + $0x17] sm:$0xff]  ;;  %v1514_v27 = vmul.f32 %v2185_v59, %v2801_v37  ;;  %v1523_v38 = vld [vmem:[#allocation4 + $0x1f] sm:$0xff]  ;;  %v1526_v12 = vmul.f32 %v2186_v24, %v1520_v43  ;;  %v1515_v5 = vmul.f32 %v2185_v59, %v2803_v56 }
 0x1ef   : > { %v1491_v53 = vadd.f32 %v1487_v30, %v1477_v26  ;;  %v1503_v55 = vadd.f32 %v1499_v33, %v1489_v31  ;;  %v1504_v34 = vadd.f32 %v1500_v28, %v1490_v46  ;;  %v1516_v35 = vadd.f32 %v1512_v57, %v1502_v51  ;;  %v1545_v6 = vld [vmem:[#allocation4 + $0xc] sm:$0xff]  ;;  %v1546_v40 = vld [vmem:[#allocation4 + $0x14] sm:$0xff]  ;;  %v1547_v29 = vld [vmem:[#allocation4 + $0x1c] sm:$0xff] }
 0x1f0   : > { %v1527_v1 = vmul.f32 %v2186_v24, %v1521_v52  ;;  %v1528_v44 = vmul.f32 %v2186_v24, %v1522_v41  ;;  %v1529_v9 = vmul.f32 %v2186_v24, %v1523_v38  ;;  %v1538_v39 = vmul.f32 %v2187_v0, %v2769_v3  ;;  %v1559_v42 = vld [vmem:[#allocation4 + $0xd] sm:$0xff]  ;;  %v1560_v16 = vld [vmem:[#allocation4 + $0x15] sm:$0xff]  ;;  %v1561_v25 = vld [vmem:[#allocation4 + $0x1d] sm:$0xff] }
 0x1f1   : > { %v1505_v48 = vadd.f32 %v1501_v54, %v1491_v53  ;;  %v1517_v45 = vadd.f32 %v1513_v32, %v1503_v55  ;;  %v1518_v50 = vadd.f32 %v1514_v27, %v1504_v34  ;;  %v1530_v8 = vadd.f32 %v1526_v12, %v1516_v35  ;;  %v1562_v20 = vld [vmem:[#allocation4 + $0x25] sm:$0xff]  ;;  %v2191_v11 = vld [vmem:[%s2880_s2 + $0x18] ss:$0 sm:$0xff] }
 0x1f2   : > { %v1539_v59 = vmul.f32 %v2187_v0, %v2772_v10  ;;  %v1551_v15 = vmul.f32 %v2188_v4, %v1545_v6  ;;  %v1552_v13 = vmul.f32 %v2188_v4, %v1546_v40  ;;  %v1553_v17 = vmul.f32 %v2188_v4, %v1547_v29  ;;  %v1573_v33 = vld [vmem:[#allocation4 + $0x26] sm:$0xff] }
 0x1f3   : > { %v1519_v7 = vadd.f32 %v1515_v5, %v1505_v48  ;;  %v1531_v22 = vadd.f32 %v1527_v1, %v1517_v45  ;;  %v1532_v49 = vadd.f32 %v1528_v44, %v1518_v50  ;;  %v1541_v14 = vadd.f32 %v1537_v2, %v1530_v8  ;;  %v2843_v48 = vld [vmem:[%s2879_s1 + $0x90] sm:$0xff]  ;;  %v2850_v50 = vld [vmem:[%s2879_s1 + $0x98] sm:$0xff] }
 0x1f4   : > { %v1565_v21 = vmul.f32 %v2189_v60, %v1559_v42  ;;  %v1554_v58 = vmul.f32 %v2188_v4, %v1548_v63  ;;  %v1566_v36 = vmul.f32 %v2189_v60, %v1560_v16  ;;  %v1567_v30 = vmul.f32 %v2189_v60, %v1561_v25 }
 0x1f5   : > { %v1533_v62 = vadd.f32 %v1529_v9, %v1519_v7  ;;  %v1542_v24 = vadd.f32 %v1538_v39, %v1531_v22  ;;  %v1543_v3 = vadd.f32 %v1539_v59, %v1532_v49  ;;  %v1555_v19 = vadd.f32 %v1551_v15, %v1541_v14 }
 0x1f6   : > { %v1576_v43 = vmul.f32 %v2190_v61, %v2798_v23  ;;  %v1568_v28 = vmul.f32 %v2189_v60, %v1562_v20  ;;  %v1577_v57 = vmul.f32 %v2190_v61, %v2801_v37  ;;  %v1578_v0 = vmul.f32 %v2190_v61, %v2803_v56  ;;  %v2833_v23 = vld [vmem:[%s2879_s1 + $0x80] sm:$0xff]  ;;  %v2838_v37 = vld [vmem:[%s2879_s1 + $0x88] sm:$0xff] }
 0x1f7   : > { %v1544_v10 = vadd.f32 %v1540_v47, %v1533_v62  ;;  %v1556_v18 = vadd.f32 %v1552_v13, %v1542_v24  ;;  %v1557_v26 = vadd.f32 %v1553_v17, %v1543_v3  ;;  %v1569_v31 = vadd.f32 %v1565_v21, %v1555_v19 }
 0x1f8   : > { %v1579_v55 = vmul.f32 %v2190_v61, %v1573_v33 }
 0x1f9   : > { %v1558_v46 = vadd.f32 %v1554_v58, %v1544_v10  ;;  %v1570_v51 = vadd.f32 %v1566_v36, %v1556_v18  ;;  %v1571_v52 = vadd.f32 %v1567_v30, %v1557_v26  ;;  %v1580_v53 = vadd.f32 %v1576_v43, %v1569_v31 }
 0x1fb   : > { %v1572_v54 = vadd.f32 %v1568_v28, %v1558_v46  ;;  %v1581_v32 = vadd.f32 %v1577_v57, %v1570_v51  ;;  %v1582_v41 = vadd.f32 %v1578_v0, %v1571_v52  ;;  %v1593_v34 = vadd.f32 %v2191_v11, %v1580_v53  ;;  %v1585_v51 = vld [vmem:[%s2880_s2 + $0x19] sm:$0x1] }
 0x1fd   : > { %v1583_v27 = vadd.f32 %v1579_v55, %v1572_v54  ;;  %v1594_v35 = vadd.f32 %v2191_v11, %v1581_v32  ;;  %v1595_v38 = vadd.f32 %v2191_v11, %v1582_v41  ;;  %v1597_v56 = vmax.f32 %v1593_v34, 0.0  ;;  %v2192_v54 = vld [vmem:[%s2880_s2 + $0x1a] ss:$0 sm:$0xff] }
 0x1ff   : > { %v1596_v12 = vadd.f32 %v2191_v11, %v1583_v27  ;;  %v1598_v4 = vmax.f32 %v1594_v35, 0.0  ;;  %v1599_v5 = vmax.f32 %v1595_v38, 0.0  ;;  %v1601_v45 = vmul.f32 %v2833_v23, %v1597_v56 }
 0x201   : > { %v1600_v1 = vmax.f32 %v1596_v12, 0.0  ;;  %v1602_v6 = vmul.f32 %v2838_v37, %v1598_v4  ;;  %v1603_v44 = vmul.f32 %v2843_v48, %v1599_v5 }
 0x203   : > { %v1605_v8 = vadd.f32 %v1602_v6, %v1601_v45  ;;  %v1604_v2 = vmul.f32 %v2850_v50, %v1600_v1 }
 0x205   : > { %v1606_v40 = vadd.f32 %v1605_v8, %v1603_v44 }
 0x207   : > { %v1607_v60 = vadd.f32 %v1606_v40, %v1604_v2 }
 0x209   : > { %v1608_v7 = vrot.slane %v1607_v60, 4 }
 0x20b   : > { %v1609_v9 = vadd.f32 %v1608_v7, %v1607_v60 }
 0x20d   : > { %v1610_v22 = vrot.slane %v1609_v9, 2 }
 0x20f   : > { %v1611_v39 = vadd.f32 %v1610_v22, %v1609_v9 }
 0x211   : > { %v1612_v29 = vrot.slane %v1611_v39, 1 }
 0x213   : > { %v1613_v42 = vadd.f32 %v1612_v29, %v1611_v39 }
 0x215   : > { %v1614_v49 = vmul.f32 0.25, %v1613_v42 }
 0x217   : > { %v1615_v59 = vsub.f32 %v1601_v45, %v1614_v49  ;;  %v1616_v14 = vsub.f32 %v1602_v6, %v1614_v49  ;;  %v1617_v63 = vsub.f32 %v1603_v44, %v1614_v49  ;;  %v1618_v15 = vsub.f32 %v1604_v2, %v1614_v49 }
 0x219   : > { %v1619_v16 = vmul.f32 %v2833_v23, %v1615_v59  ;;  %v1620_v61 = vmul.f32 %v2838_v37, %v1616_v14  ;;  %v1621_v62 = vmul.f32 %v2843_v48, %v1617_v63  ;;  %v1622_v47 = vmul.f32 %v2850_v50, %v1618_v15 }
 0x21b   : > { %v1623_v24 = vmul.f32 %v1619_v16, %v1619_v16  ;;  %v1624_v13 = vmul.f32 %v1620_v61, %v1620_v61  ;;  %v1625_v25 = vmul.f32 %v1621_v62, %v1621_v62  ;;  %v1626_v17 = vmul.f32 %v1622_v47, %v1622_v47 }
 0x21d   : > { %v1627_v3 = vadd.f32 %v1624_v13, %v1623_v24 }
 0x21f   : > { %v1628_v19 = vadd.f32 %v1627_v3, %v1625_v25 }
 0x221   : > { %v1629_v20 = vadd.f32 %v1628_v19, %v1626_v17 }
 0x223   : > { %v1630_v21 = vrot.slane %v1629_v20, 4 }
 0x225   : > { %v1631_v10 = vadd.f32 %v1630_v21, %v1629_v20 }
 0x227   : > { %v1632_v58 = vrot.slane %v1631_v10, 2 }
 0x229   : > { %v1633_v18 = vadd.f32 %v1632_v58, %v1631_v10 }
 0x22b   : > { %v1634_v36 = vrot.slane %v1633_v18, 1 }
 0x22d   : > { %v1635_v26 = vadd.f32 %v1634_v36, %v1633_v18 }
 0x22f   : > { %v1636_v30 = vmul.f32 0.25, %v1635_v26 }
 0x231   : > { %v1637_v31 = vadd.f32 1e-05, %v1636_v30 }
 0x233   : > { %2197 = vrsqrt.f32 %v1637_v31  ;;  %vm1644_vm7 = vweird.f32 %v1637_v31 }
 0x239   : > { %v2198_v33 = vpop.eup %2197 }
 0x23a   : > { %v1639_v43 = vmul.f32 %v2198_v33, %v1637_v31  ;;  %vm1645_vm6 = vweird.f32 %v2198_v33 }
 0x23b   : > { %vm1646_vm8 = vmor %vm1644_vm7, %vm1645_vm6 }
 0x23c   : > { %v1640_v11 = vmul.f32 %v2198_v33, %v1639_v43 }
 0x23e   : > { %v1641_v46 = vmul.f32 0.5, %v1640_v11 }
 0x240   : > { %v1642_v28 = vsub.f32 1.5, %v1641_v46 }
 0x242   : > { %v1643_v57 = vmul.f32 %v2198_v33, %v1642_v28 }
 0x244   : > { %v1647_v52 = vsel %vm1646_vm8, %v2198_v33, %v1643_v57 }
 0x245   : > { %v1648_v0 = vmul.f32 %v1647_v52, %v1585_v51 }
 0x247   : > { %v1649_v53 = vperm.slane %v1648_v0, 0 }
 0x249   : > { %v1650_v55 = vmul.f32 %v1649_v53, %v1619_v16  ;;  %v1651_v32 = vmul.f32 %v1649_v53, %v1620_v61  ;;  %v1652_v41 = vmul.f32 %v1649_v53, %v1621_v62  ;;  %v1653_v34 = vmul.f32 %v1649_v53, %v1622_v47 }
 0x24b   : > { %v1655_v27 = vadd.f32 %v2192_v54, %v1650_v55  ;;  %v1656_v35 = vadd.f32 %v2192_v54, %v1651_v32  ;;  %v1657_v38 = vadd.f32 %v2192_v54, %v1652_v41  ;;  %v1658_v56 = vadd.f32 %v2192_v54, %v1653_v34 }
 0x24d   : > { %v1659_v12 = vmul.f32 %v2833_v23, %v1655_v27  ;;  %v1660_v4 = vmul.f32 %v2838_v37, %v1656_v35  ;;  %v1661_v5 = vmul.f32 %v2843_v48, %v1657_v38  ;;  %v1662_v1 = vmul.f32 %v2850_v50, %v1658_v56  ;;  %v1689_v23 = vld [vmem:[%s2880_s2 + $0x1b] sm:$0x1] }
 0x24f   : > { %v1663_v45 = vadd.f32 %v1660_v4, %v1659_v12 }
 0x251   : > { %v1664_v6 = vadd.f32 %v1663_v45, %v1661_v5 }
 0x253   : > { %v1665_v44 = vadd.f32 %v1664_v6, %v1662_v1 }
 0x255   : > { %v1666_v8 = vrot.slane %v1665_v44, 4 }
 0x257   : > { %v1667_v2 = vadd.f32 %v1666_v8, %v1665_v44 }
 0x259   : > { %v1668_v40 = vrot.slane %v1667_v2, 2 }
 0x25b   : > { %v1669_v60 = vadd.f32 %v1668_v40, %v1667_v2 }
 0x25d   : > { %v1670_v7 = vrot.slane %v1669_v60, 1 }
 0x25f   : > { %v1671_v9 = vadd.f32 %v1670_v7, %v1669_v60 }
 0x261   : > { %v1672_v22 = vmul.f32 0.25, %v1671_v9 }
 0x263   : > { %1706 = vmatmul.f32.vlgmr.msra.gmra.mxu2 %v1672_v22 }
 0x2e6   : > { %v1707_v37 = vpop.f32.mrf.mxu2 }
 0x2e7   : > { %v1708_v48 = vadd.f32 %v1707_v37, %v1689_v23 }
 0x2e9   : > { %v1710_v50 = vperm.slane %v1708_v48, 0 }
 0x2eb   : > { %1711 = vst [vmem:[%s222_s20] sm:$0xff] %v1710_v50 }
 0x2ec PF: > { %s15_s18 = sadd.s32 1, %s2205_s18  }
 0x2ed   : > { %p12_p4 = scmp.ge.s32.totalorder %s15_s18, 6  }
 0x2ef   :  { %14 = sbr.rel (!%p12_p4) target bundleno = 1 (0x1), region = 72 }

</bundles_post_ra>
